<compile_context>
chip_gen: v7x
topology: tpu7x:2x2x1
jax: 0.10.0
libtpu: 0.0.40
codegen_flags: <defaults>
</compile_context>

<pallas_src>
import functools

import jax
import jax.numpy as jnp
from jax.experimental import pallas as pl
from jax.experimental.pallas import tpu as pltpu

IN_DIM = 3 * 8 * 8     # 192
HID = 600
HID_PAD = 640          # 600 padded to a multiple of 128 lanes
NEG_SLOPE = 0.01       # F.leaky_relu default


def _round_up(n, m):
    return ((n + m - 1) // m) * m


def _leaky_relu(v):
    # max(v, 0.01*v): 2 VPU ops, equivalent to where(v>0, v, 0.01*v).
    return jnp.maximum(v, NEG_SLOPE * v)


def _disc2_kernel(x_ref, w1_ref, b1_ref, w2_ref, b2_ref, w3_ref, o_ref,
                  *, block_b, true_b, has_pad):
    i = pl.program_id(0)

    # Cast x f32 -> bf16 in-kernel (hidden under MXU/DMA; avoids an extra
    # wrapper-side XLA pass over x).
    x_bf = x_ref[...].astype(jnp.bfloat16)

    # Layer 1: (blk, 192) bf16 @ (192, 640) bf16 -> f32 on the MXU.
    h1 = jnp.dot(x_bf, w1_ref[...], preferred_element_type=jnp.float32)
    h1 = _leaky_relu(h1 + b1_ref[...])

    # Layer 2: (blk, 640) @ (640, 640).
    h2 = jnp.dot(h1.astype(jnp.bfloat16), w2_ref[...],
                 preferred_element_type=jnp.float32)
    h2 = _leaky_relu(h2 + b2_ref[...])

    # Per-block partial of sum_rows(h2 @ w3): column-sum (XLU) then a VPU
    # multiply + lane reduce against the w3 row (fc3+mean are linear, so the
    # wrapper finishes with sum(partials)/B + b3).
    colsum = jnp.sum(h2, axis=0, keepdims=True)                        # (1, 640)
    o_ref[...] = jnp.sum(colsum * w3_ref[...], axis=1, keepdims=True)[None]

    if has_pad:
        # Only the last block contains batch-padding rows (bias garbage);
        # recompute its partial with the rows masked out.
        @pl.when(i == pl.num_programs(0) - 1)
        def _():
            row = i * block_b + jax.lax.broadcasted_iota(
                jnp.int32, (block_b, 1), 0)
            h2m = jnp.where(row < true_b, h2, 0.0)
            cs = jnp.sum(h2m, axis=0, keepdims=True)
            o_ref[...] = jnp.sum(cs * w3_ref[...], axis=1, keepdims=True)[None]


def discriminator_two_forward(x, params, *, block_b=1024):
    """x: (B, 3, 8, 8) float32. params from init_params/prepare_params.
    Returns shape (1,) like the torch module."""
    w1, b1, w2, b2, w3, b3 = params
    b = x.shape[0]
    x2d = x.reshape(b, IN_DIM)                      # stays f32; bf16 cast in-kernel

    blk = min(block_b, _round_up(b, 256))           # 256-aligned full MXU row passes
    blk = _round_up(blk, 8)                         # f32 sublane alignment
    b_pad = _round_up(b, blk)
    if b_pad != b:
        x2d = jnp.pad(x2d, ((0, b_pad - b), (0, 0)))
    grid = b_pad // blk

    kernel = functools.partial(_disc2_kernel, block_b=blk, true_b=b,
                               has_pad=(b_pad != b))

    partials = pl.pallas_call(
        kernel,
        out_shape=jax.ShapeDtypeStruct((grid, 1, 1), jnp.float32),
        grid_spec=pltpu.PrefetchScalarGridSpec(
            num_scalar_prefetch=0,
            grid=(grid,),
            in_specs=[
                pl.BlockSpec((blk, IN_DIM), lambda i: (i, 0)),        # x tile (f32)
                pl.BlockSpec((IN_DIM, HID_PAD), lambda i: (0, 0)),    # w1 (resident)
                pl.BlockSpec((1, HID_PAD), lambda i: (0, 0)),         # b1
                pl.BlockSpec((HID_PAD, HID_PAD), lambda i: (0, 0)),   # w2 (resident)
                pl.BlockSpec((1, HID_PAD), lambda i: (0, 0)),         # b2
                pl.BlockSpec((1, HID_PAD), lambda i: (0, 0)),         # w3 row vector
            ],
            out_specs=pl.BlockSpec((1, 1, 1), lambda i: (i, 0, 0)),   # per-block partial
        ),
        compiler_params=pltpu.CompilerParams(
            dimension_semantics=("parallel",),      # no carried state -> megacore OK
            vmem_limit_bytes=48 * 1024 * 1024,
        ),
    )(x2d, w1, b1, w2, b2, w3)

    # mean(fc3(h2)) == (sum_b h2 @ w3) / B + b3  (fc3 is linear in h2).
    out = jnp.sum(partials) * (1.0 / b) + b3.reshape(())
    return out.reshape(1)


def prepare_params(w1, b1, w2, b2, w3, b3):
    """Pad HID 600->640 with zeros (results unchanged), store matmul weights
    bf16, biases + final projection f32. Weights are (in, out) layout."""
    pad = HID_PAD - HID
    w1p = jnp.pad(w1, ((0, 0), (0, pad))).astype(jnp.bfloat16)     # (192, 640)
    b1p = jnp.pad(b1, ((0, 0), (0, pad))).astype(jnp.float32)      # (1, 640)
    w2p = jnp.pad(w2, ((0, pad), (0, pad))).astype(jnp.bfloat16)   # (640, 640)
    b2p = jnp.pad(b2, ((0, 0), (0, pad))).astype(jnp.float32)      # (1, 640)
    w3p = jnp.pad(w3.reshape(1, HID), ((0, 0), (0, pad))).astype(jnp.float32)  # (1, 640)
    b3p = b3.astype(jnp.float32)                                   # (1, 1)
    return (w1p, b1p, w2p, b2p, w3p, b3p)


def init_params(key):
    """nn.Linear default init: U(-1/sqrt(fan_in), +1/sqrt(fan_in))."""
    def linear(k, fan_in, fan_out):
        kw, kb = jax.random.split(k)
        bound = 1.0 / jnp.sqrt(fan_in)
        w = jax.random.uniform(kw, (fan_in, fan_out), jnp.float32, -bound, bound)
        b = jax.random.uniform(kb, (1, fan_out), jnp.float32, -bound, bound)
        return w, b

    k1, k2, k3 = jax.random.split(key, 3)
    w1, b1 = linear(k1, IN_DIM, HID)
    w2, b2 = linear(k2, HID, HID)
    w3, b3 = linear(k3, HID, 1)
    return prepare_params(w1, b1, w2, b2, w3, b3)


if __name__ == "__main__":
    key = jax.random.PRNGKey(0)
    k_param, k_x = jax.random.split(key)

    params = init_params(k_param)
    B = 20
    x = jax.random.normal(k_x, (B, 3, 8, 8), dtype=jnp.float32)   # NCHW, small batch

    # Reference in plain JAX with the SAME (bf16-padded) params, computed the
    # "original" way: fc3 then mean over batch.
    # (bf16 weights deviate slightly from the f32 PyTorch module; acceptable
    #  for a WGAN critic — the reference uses the same bf16 math.)
    w1, b1, w2, b2, w3, b3 = params
    x2d = x.reshape(B, IN_DIM).astype(jnp.bfloat16)
    h1 = jnp.dot(x2d, w1, preferred_element_type=jnp.float32) + b1
    h1 = jnp.where(h1 > 0, h1, NEG_SLOPE * h1)
    h2 = jnp.dot(h1.astype(jnp.bfloat16), w2, preferred_element_type=jnp.float32) + b2
    h2 = jnp.where(h2 > 0, h2, NEG_SLOPE * h2)
    h3 = jnp.dot(h2, w3.T) + b3                                   # (B, 1)
    ref = jnp.mean(h3, axis=0).reshape(1)

    # Small block: exercises multi-block grid + last-block batch-padding mask.
    out_small = discriminator_two_forward(x, params, block_b=8)
    jax.block_until_ready(out_small)
    assert out_small.shape == (1,), out_small.shape
    assert jnp.allclose(out_small, ref, atol=1e-3, rtol=1e-3), (out_small, ref)

    # Default (large) block: single 256-row block, padded-batch path.
    out_big = discriminator_two_forward(x, params)
    jax.block_until_ready(out_big)
    assert out_big.shape == (1,), out_big.shape
    assert jnp.allclose(out_big, ref, atol=1e-3, rtol=1e-3), (out_big, ref)

    print("KERNEL_OK")
</pallas_src>

<mosaic_0001>
module attributes {stable_mosaic.version = 11 : i64} {
  func.func @_disc2_kernel(%arg0: i32, %arg1: memref<8x192xf32, #tpu.memory_space<vmem>>, %arg2: memref<192x640xbf16, #tpu.memory_space<vmem>>, %arg3: memref<1x640xf32, #tpu.memory_space<vmem>>, %arg4: memref<640x640xbf16, #tpu.memory_space<vmem>>, %arg5: memref<1x640xf32, #tpu.memory_space<vmem>>, %arg6: memref<1x640xf32, #tpu.memory_space<vmem>>, %arg7: memref<1x1x1xf32, #tpu.memory_space<vmem>>) attributes {dimension_semantics = [#tpu.dimension_semantics<parallel>], iteration_bounds = array<i64: 3>, scalar_prefetch = 0 : i64, scratch_operands = 0 : i64, tpu.core_type = #tpu.core_type<tc>, window_params = [{transform_indices = @transform_0, window_bounds = array<i64: 8, 192>}, {pipeline_mode = #tpu.pipeline_mode<synchronous>, transform_indices = @transform_1, window_bounds = array<i64: 192, 640>}, {pipeline_mode = #tpu.pipeline_mode<synchronous>, transform_indices = @transform_2, window_bounds = array<i64: 1, 640>}, {pipeline_mode = #tpu.pipeline_mode<synchronous>, transform_indices = @transform_3, window_bounds = array<i64: 640, 640>}, {pipeline_mode = #tpu.pipeline_mode<synchronous>, transform_indices = @transform_4, window_bounds = array<i64: 1, 640>}, {pipeline_mode = #tpu.pipeline_mode<synchronous>, transform_indices = @transform_5, window_bounds = array<i64: 1, 640>}, {transform_indices = @transform_6, window_bounds = array<i64: 1, 1, 1>}]} {
    %c0 = arith.constant 0 : index
    %c0_0 = arith.constant 0 : index
    %0 = vector.load %arg1[%c0, %c0_0] : memref<8x192xf32, #tpu.memory_space<vmem>>, vector<8x192xf32>
    %1 = arith.truncf %0 : vector<8x192xf32> to vector<8x192xbf16>
    %c0_1 = arith.constant 0 : index
    %c0_2 = arith.constant 0 : index
    %2 = vector.load %arg2[%c0_1, %c0_2] : memref<192x640xbf16, #tpu.memory_space<vmem>>, vector<192x640xbf16>
    %cst = arith.constant dense<0.000000e+00> : vector<8x640xf32>
    %3 = tpu.matmul %1, %2, %cst {dimension_numbers = #tpu.dot_dimension_numbers<[1], [0], [0], [1], [0, 0, 1, 1], [], []>} : vector<8x192xbf16>, vector<192x640xbf16>, vector<8x640xf32> -> vector<8x640xf32>
    %c0_3 = arith.constant 0 : index
    %c0_4 = arith.constant 0 : index
    %4 = vector.load %arg3[%c0_3, %c0_4] : memref<1x640xf32, #tpu.memory_space<vmem>>, vector<1x640xf32>
    %5 = vector.broadcast %4 : vector<1x640xf32> to vector<8x640xf32>
    %6 = arith.addf %3, %5 : vector<8x640xf32>
    %cst_5 = arith.constant 0.00999999977 : f32
    %7 = vector.broadcast %cst_5 : f32 to vector<8x640xf32>
    %8 = arith.mulf %7, %6 : vector<8x640xf32>
    %9 = arith.maximumf %6, %8 : vector<8x640xf32>
    %10 = arith.truncf %9 : vector<8x640xf32> to vector<8x640xbf16>
    %c0_6 = arith.constant 0 : index
    %c0_7 = arith.constant 0 : index
    %11 = vector.load %arg4[%c0_6, %c0_7] : memref<640x640xbf16, #tpu.memory_space<vmem>>, vector<640x640xbf16>
    %cst_8 = arith.constant dense<0.000000e+00> : vector<8x640xf32>
    %12 = tpu.matmul %10, %11, %cst_8 {dimension_numbers = #tpu.dot_dimension_numbers<[1], [0], [0], [1], [0, 0, 1, 1], [], []>} : vector<8x640xbf16>, vector<640x640xbf16>, vector<8x640xf32> -> vector<8x640xf32>
    %c0_9 = arith.constant 0 : index
    %c0_10 = arith.constant 0 : index
    %13 = vector.load %arg5[%c0_9, %c0_10] : memref<1x640xf32, #tpu.memory_space<vmem>>, vector<1x640xf32>
    %14 = vector.broadcast %13 : vector<1x640xf32> to vector<8x640xf32>
    %15 = arith.addf %12, %14 : vector<8x640xf32>
    %cst_11 = arith.constant 0.00999999977 : f32
    %16 = vector.broadcast %cst_11 : f32 to vector<8x640xf32>
    %17 = arith.mulf %16, %15 : vector<8x640xf32>
    %18 = arith.maximumf %15, %17 : vector<8x640xf32>
    %cst_12 = arith.constant dense<0.000000e+00> : vector<640xf32>
    %19 = vector.multi_reduction <add>, %18, %cst_12 [0] : vector<8x640xf32> to vector<640xf32>
    %20 = vector.shape_cast %19 : vector<640xf32> to vector<1x640xf32>
    %c0_13 = arith.constant 0 : index
    %c0_14 = arith.constant 0 : index
    %21 = vector.load %arg6[%c0_13, %c0_14] : memref<1x640xf32, #tpu.memory_space<vmem>>, vector<1x640xf32>
    %22 = arith.mulf %20, %21 : vector<1x640xf32>
    %cst_15 = arith.constant dense<0.000000e+00> : vector<1xf32>
    %23 = vector.multi_reduction <add>, %22, %cst_15 [1] : vector<1x640xf32> to vector<1xf32>
    %24 = vector.shape_cast %23 : vector<1xf32> to vector<1x1xf32>
    %25 = vector.shape_cast %24 : vector<1x1xf32> to vector<1x1x1xf32>
    %c0_16 = arith.constant 0 : index
    %c0_17 = arith.constant 0 : index
    %c0_18 = arith.constant 0 : index
    %26 = vector.load %arg7[%c0_16, %c0_17, %c0_18] : memref<1x1x1xf32, #tpu.memory_space<vmem>>, vector<1x1x1xf32>
    tpu.vector_store %arg7[%c0_16, %c0_17, %c0_18], %25 {strides = array<i32>} : memref<1x1x1xf32, #tpu.memory_space<vmem>>, vector<1x1x1xf32>,
    %c2_i32 = arith.constant 2 : i32
    %27 = arith.cmpi eq, %arg0, %c2_i32 : i32
    %28 = arith.extui %27 : i1 to i32
    %c0_i32 = arith.constant 0 : i32
    %29 = arith.cmpi ne, %28, %c0_i32 : i32
    scf.if %29 {
      %c8_i32 = arith.constant 8 : i32
      %30 = arith.muli %arg0, %c8_i32 : i32
      %31 = tpu.iota {dimensions = array<i32: 0>} : vector<8x1xi32>
      %32 = vector.broadcast %30 : i32 to vector<8x1xi32>
      %33 = arith.addi %32, %31 : vector<8x1xi32>
      %c20_i32 = arith.constant 20 : i32
      %34 = vector.broadcast %c20_i32 : i32 to vector<8x1xi32>
      %35 = arith.cmpi slt, %33, %34 : vector<8x1xi32>
      %cst_19 = arith.constant 0.000000e+00 : f32
      %36 = vector.shape_cast %35 : vector<8x1xi1> to vector<8x1xi1>
      %37 = vector.broadcast %36 : vector<8x1xi1> to vector<8x640xi1>
      %38 = vector.broadcast %cst_19 : f32 to vector<8x640xf32>
      %39 = arith.select %37, %18, %38 : vector<8x640xi1>, vector<8x640xf32>
      %cst_20 = arith.constant dense<0.000000e+00> : vector<640xf32>
      %40 = vector.multi_reduction <add>, %39, %cst_20 [0] : vector<8x640xf32> to vector<640xf32>
      %41 = vector.shape_cast %40 : vector<640xf32> to vector<1x640xf32>
      %c0_21 = arith.constant 0 : index
      %c0_22 = arith.constant 0 : index
      %42 = vector.load %arg6[%c0_21, %c0_22] : memref<1x640xf32, #tpu.memory_space<vmem>>, vector<1x640xf32>
      %43 = arith.mulf %41, %42 : vector<1x640xf32>
      %cst_23 = arith.constant dense<0.000000e+00> : vector<1xf32>
      %44 = vector.multi_reduction <add>, %43, %cst_23 [1] : vector<1x640xf32> to vector<1xf32>
      %45 = vector.shape_cast %44 : vector<1xf32> to vector<1x1xf32>
      %46 = vector.shape_cast %45 : vector<1x1xf32> to vector<1x1x1xf32>
      %c0_24 = arith.constant 0 : index
      %c0_25 = arith.constant 0 : index
      %c0_26 = arith.constant 0 : index
      %47 = vector.load %arg7[%c0_24, %c0_25, %c0_26] : memref<1x1x1xf32, #tpu.memory_space<vmem>>, vector<1x1x1xf32>
      tpu.vector_store %arg7[%c0_24, %c0_25, %c0_26], %46 {strides = array<i32>} : memref<1x1x1xf32, #tpu.memory_space<vmem>>, vector<1x1x1xf32>,
    } else {
    }
    return
  }
  func.func @transform_0(%arg0: i32) -> (i32, i32) {
    %c0_i32 = arith.constant 0 : i32
    %c0_i32_0 = arith.constant 0 : i32
    return %arg0, %c0_i32 : i32, i32
  }
  func.func @transform_1(%arg0: i32) -> (i32, i32) {
    %c0_i32 = arith.constant 0 : i32
    %c0_i32_0 = arith.constant 0 : i32
    %c0_i32_1 = arith.constant 0 : i32
    return %c0_i32, %c0_i32_0 : i32, i32
  }
  func.func @transform_2(%arg0: i32) -> (i32, i32) {
    %c0_i32 = arith.constant 0 : i32
    %c0_i32_0 = arith.constant 0 : i32
    %c0_i32_1 = arith.constant 0 : i32
    return %c0_i32, %c0_i32_0 : i32, i32
  }
  func.func @transform_3(%arg0: i32) -> (i32, i32) {
    %c0_i32 = arith.constant 0 : i32
    %c0_i32_0 = arith.constant 0 : i32
    %c0_i32_1 = arith.constant 0 : i32
    return %c0_i32, %c0_i32_0 : i32, i32
  }
  func.func @transform_4(%arg0: i32) -> (i32, i32) {
    %c0_i32 = arith.constant 0 : i32
    %c0_i32_0 = arith.constant 0 : i32
    %c0_i32_1 = arith.constant 0 : i32
    return %c0_i32, %c0_i32_0 : i32, i32
  }
  func.func @transform_5(%arg0: i32) -> (i32, i32) {
    %c0_i32 = arith.constant 0 : i32
    %c0_i32_0 = arith.constant 0 : i32
    %c0_i32_1 = arith.constant 0 : i32
    return %c0_i32, %c0_i32_0 : i32, i32
  }
  func.func @transform_6(%arg0: i32) -> (i32, i32, i32) {
    %c0_i32 = arith.constant 0 : i32
    %c0_i32_0 = arith.constant 0 : i32
    %c0_i32_1 = arith.constant 0 : i32
    return %arg0, %c0_i32, %c0_i32_0 : i32, i32, i32
  }
}

</mosaic_0001>

<bundles_post_ra>
// kernel: tpu_custom_call.1
= control target key start
LH: loop header
LB: loop body
LE: loop exit
PB: predicated region body
PF: predicated region fallthrough
CT: control target
= control target key end

     0   :  { %11 = vsyncpa [#allocation3], 0  ;;  %s4090_s0 = inlined_call_operand.hbm [shape: f32[24,192], index: 0, kind: input, shape index: {}]   ;;  %s4091_s1 = inlined_call_operand.hbm [shape: bf16[192,640], index: 1, kind: input, shape index: {}]   ;;  %s4092_s2 = inlined_call_operand.vmem [shape: f32[1,640], index: 2, kind: input, shape index: {}]   ;;  %s4093_s3 = inlined_call_operand.hbm [shape: bf16[640,640], index: 3, kind: input, shape index: {}]   ;;  %s4094_s4 = inlined_call_operand.vmem [shape: f32[1,640], index: 4, kind: input, shape index: {}]   ;;  %s4095_s5 = inlined_call_operand.vmem [shape: f32[1,640], index: 5, kind: input, shape index: {}]   ;;  %s4096_s6 = inlined_call_operand.vmem [shape: f32[3,1,1], index: 6, kind: output, shape index: {}]  }
   0x1   :  { %13 = vsyncpa [#allocation3 + $0x1], 0 }
   0x2   :  { %14 = vsyncpa [#allocation5], 0  ;;  %s3751_s21 = smov 0   ;;  %s3753_s22 = smov 0  }
   0x3   :  { %s3755_s23 = smov 0   ;;  %s3757_s24 = smov 0  }
   0x4 LB: > { %s3770_s25 = sadd.s32 4294967295, %s3706_s24   ;;  %p40_p0 = scmp.ne.s32.totalorder %s3698_s22, %s3694_s21  ;;  %s3706_s24 = sphi %s3757_s24, %s4111_s24   ;;  %s3702_s23 = sphi %s3755_s23, %s4110_s23   ;;  %s3698_s22 = sphi %s3753_s22, %s4109_s22   ;;  %s3694_s21 = sphi %s3751_s21, %s4108_s21  }
   0x5   : > { %p4097_p1 = scmp.eq.s32.totalorder %s3770_s25, 0  ;;  %p2781_p2 = scmp.ge.s32.totalorder %s3706_s24, 1 }
   0x6   : > { %p182_p3 = scmp.lt.s32.totalorder %s3706_s24, 4  ;;  %s3708_s28 = smov [#allocation4]  }
   0x7   : > { %p3778_p4 = por %p4097_p1, %p40_p0  ;;  %s194_s29 = sshll.u32 %s3708_s28, 4  ;;  %s195_s29 = int_to_ptr.vmem [resolvable:$true] %s194_s29 }
   0x8   : > { %p3782_p5 = pnand %p2781_p2, %p182_p3  ;;  %s3709_s7 = smov [#allocation6]  }
   0x9   : > { %s4100_s26 = scalar_select %p3778_p4, 1, 0 }
   0xa   : > { %s4101_s27 = scalar_select %p3782_p5, 1, 0 }
   0xb   : > { %p3163_p6 = pneg %p3782_p5  ;;  %s210_s8 = sshll.u32 %s3709_s7, 4  ;;  %s3794_s8 = int_to_ptr.vmem [resolvable:$true] %s210_s8 }
   0xc   : > { %s3582_s11 = scalar_lea.hbm %s4091_s1, 7680 }
   0xd   : > { %p3790_p7 = pnand %p3163_p6, %p4097_p1  ;;  %p3583_p8 = scmp.ne.s32.totalorder %s4091_s1, %s3582_s11 }
   0xe   : > { %p3589_p12 = scmp.lt.u32.totalorder %s3582_s11, %s4091_s1 }
   0xf   : > { %p3584_p9 = pneg %p3790_p7 }
  0x11   : > { %p3585_p10 = pnand %p3584_p9, %p3583_p8 }
  0x13   : > { %p3586_p11 = pneg %p3585_p10 }
  0x15   : > { %p3591_p13 = pnand %p3589_p12, %p3586_p11 }
  0x17   : > { %3594 = shalt.err (!%p3591_p13)
}
  0x18   : > { %s3595_s16 = scalar_lea.vmem %s195_s29, 7680  ;;  %p3603_p6 = scmp.lt.s32.totalorder %s195_s29, %s195_s29 }
  0x19   : > { %p3596_p0 = scmp.ne.s32.totalorder %s195_s29, %s3595_s16  ;;  %p3604_p1 = scmp.lt.s32.totalorder %s3595_s16, %s3595_s16 }
  0x1b   : > { %p3598_p2 = pnand %p3596_p0, %p3584_p9  ;;  %p3605_p4 = por %p3604_p1, %p3603_p6 }
  0x1d   : > { %p3599_p3 = pneg %p3598_p2 }
  0x1f   : > { %p3606_p5 = pnand %p3605_p4, %p3599_p3 }
  0x21   : > { %3609 = shalt.err (!%p3606_p5)
}
  0x22   : > { %s3710_s17 = smov 320   ;;  %s3711_s18 = smov 20  }
  0x23   : > { %3166 = dma.hbm_to_vmem [thread:$0]  (!%p3790_p7), %s4091_s1, 7680, %s195_s29, [#allocation5], %s3710_s17, %s3710_s17, %s3711_s18  }
  0x24   : > { %s3610_s7 = scalar_lea.hbm %s4093_s3, 25600 }
  0x25   : > { %p3611_p8 = scmp.ne.s32.totalorder %s4093_s3, %s3610_s7  ;;  %p3617_p5 = scmp.lt.u32.totalorder %s3610_s7, %s4093_s3 }
  0x27   : > { %p3613_p1 = pnand %p3611_p8, %p3584_p9 }
  0x29   : > { %p3614_p4 = pneg %p3613_p1 }
  0x2b   : > { %p3619_p10 = pnand %p3617_p5, %p3614_p4 }
  0x2d   : > { %3622 = shalt.err (!%p3619_p10)
}
  0x2e   : > { %s3623_s29 = scalar_lea.vmem %s3794_s8, 25600  ;;  %p3631_p0 = scmp.lt.s32.totalorder %s3794_s8, %s3794_s8 }
  0x2f   : > { %p3624_p11 = scmp.ne.s32.totalorder %s3794_s8, %s3623_s29  ;;  %p3632_p2 = scmp.lt.s32.totalorder %s3623_s29, %s3623_s29 }
  0x31   : > { %p3626_p12 = pnand %p3624_p11, %p3584_p9  ;;  %p3633_p3 = por %p3632_p2, %p3631_p0 }
  0x33   : > { %p3627_p13 = pneg %p3626_p12 }
  0x35   : > { %p3634_p6 = pnand %p3633_p3, %p3627_p13 }
  0x37   : > { %3637 = shalt.err (!%p3634_p6)
}
  0x38   : > { %3169 = dma.hbm_to_vmem [thread:$0]  (!%p3790_p7), %s4093_s3, 25600, %s3794_s8, [#allocation5], %s3710_s17, %s3710_s17, %s3711_s18  }
  0x39   : > { %s3844_s15 = sadd.s32 1, %s3706_s24   ;;  %s27_s16 = sadd.s32 1, %s3702_s23 }
  0x3a   : > { %s24_s30 = ssub.s32 %s3706_s24, %s3844_s15  ;;  %p34_p9 = scmp.ne.s32.totalorder %s3702_s23, %s3698_s22 }
  0x3b   : > { %p25_p8 = scmp.eq.s32.totalorder %s24_s30, 0  ;;  %p35_p1 = scmp.eq.s32.totalorder %s3706_s24, 0 }
  0x3c   : > { %p3176_p4 = scmp.lt.s32.totalorder %s3706_s24, 3  ;;  %s230_s19 = sand.u32 1, %s3702_s23  }
  0x3d   : > { %s3855_s20 = scalar_select %p25_p8, %s3702_s23, %s27_s16  }
  0x3e   : > { %p36_p5 = por %p35_p1, %p34_p9  ;;  %s2785_s21 = sshll.u32 %s230_s19, 4 }
  0x3f   : > { %s3059_s28 = sshll.u32 %s3706_s24, 8  ;;  %s234_s8 = scalar_lea.vmem [#allocation2], %s2785_s21 }
  0x40   : > { %s3861_s10 = scalar_lea.hbm %s4090_s0, %s3059_s28  ;;  %s242_s17 = sshll.u32 %s234_s8, 4  ;;  %s3867_s17 = int_to_ptr.vmem [resolvable:$true] %s242_s17 }
  0x41   : > { %p3863_p7 = pnand %p3176_p4, %p36_p5  ;;  %s231_s24 = scalar_lea.sflag [#allocation3], %s230_s19 }
  0x42   : > { %s3638_s11 = scalar_lea.hbm %s3861_s10, 256  ;;  %s3643_s13 = scalar_lea.hbm %s4090_s0, 768 }
  0x43   : > { %p3639_p10 = scmp.ne.s32.totalorder %s3861_s10, %s3638_s11  ;;  %p3640_p11 = pneg %p3863_p7 }
  0x44   : > { %p3644_p0 = scmp.lt.u32.totalorder %s3861_s10, %s4090_s0  ;;  %p3645_p2 = scmp.lt.u32.totalorder %s3643_s13, %s3638_s11 }
  0x45   : > { %p3641_p12 = pnand %p3640_p11, %p3639_p10  ;;  %p3647_p6 = scmp.lt.u32.totalorder %s3638_s11, %s3861_s10 }
  0x46   : > { %p3646_p3 = por %p3645_p2, %p3644_p0 }
  0x47   : > { %p3642_p13 = pneg %p3641_p12 }
  0x48   : > { %p3648_p9 = por %p3647_p6, %p3646_p3 }
  0x4a   : > { %p3649_p8 = pnand %p3648_p9, %p3642_p13 }
  0x4c   : > { %3652 = shalt.err (!%p3649_p8)
}
  0x4d   : > { %s3653_s30 = scalar_lea.vmem %s3867_s17, 256  ;;  %s3712_s19 = smov [#allocation2]  }
  0x4e   : > { %p3654_p1 = scmp.ne.s32.totalorder %s3867_s17, %s3653_s30  ;;  %s3658_s21 = sshll.u32 %s3712_s19, 4  ;;  %s3659_s21 = int_to_ptr.vmem [resolvable:$false] %s3658_s21 }
  0x4f   : > { %s3660_s28 = scalar_lea.vmem %s3659_s21, 512  ;;  %p3661_p10 = scmp.lt.s32.totalorder %s3867_s17, %s3659_s21 }
  0x50   : > { %p3656_p4 = pnand %p3654_p1, %p3640_p11  ;;  %p3662_p12 = scmp.lt.s32.totalorder %s3660_s28, %s3653_s30 }
  0x52   : > { %p3657_p5 = pneg %p3656_p4  ;;  %p3663_p0 = por %p3662_p12, %p3661_p10 }
  0x54   : > { %p3664_p2 = pnand %p3663_p0, %p3657_p5 }
  0x56   : > { %3667 = shalt.err (!%p3664_p2)
}
  0x57   : > { %3173 = dma.hbm_to_vmem [thread:$0]  (!%p3863_p7), %s3861_s10, 256, %s3867_s17, %s231_s24  }
  0x58   : > { %p4104_p13 = scmp.ne.s32.totalorder %s4101_s27, 0 }
  0x59   : > { %s253_s7 = sand.u32 (!%p4104_p13), 1, %s3698_s22   ;;  %p4105_p11 = scmp.ne.s32.totalorder (!%p4104_p13), %s4100_s26, 0 }
  0x5a   : > { %251 = sbr.rel (%p4104_p13) target bundleno = 924 (0x39c), region = 44  ;;  %s3897_s9 = sshll.u32 (!%p4104_p13), %s253_s7, 4 }
  0x5b   : > { %s254_s8 = scalar_lea.sflag (!%p4104_p13), [#allocation3], %s253_s7  ;;  %s257_s11 = scalar_lea.vmem (!%p4104_p13), [#allocation2], %s3897_s9 }
  0x61   : > { %3685 = dma.done.wait (%p4105_p11), %s254_s8, 256  }
  0x62   : > { %3687 = vsyncadd (%p4105_p11), %s254_s8, 4294967040  ;;  %p4106_p3 = scmp.eq.s32.totalorder %s3770_s25, 0 }
  0x64   : > { %3689 = dma.done.wait (%p4106_p3), [#allocation5], 33280   ;;  %p4107_p7 = pmov %p4106_p3 }
  0x65   : > { %v3218_v0 = vld [vmem:[#allocation4 + $0x4] ss:$20 sps:$4 sm:$0xff]   ;;  %v3220_v1 = vld [vmem:[#allocation4] ss:$20 sps:$4 sm:$0xff]   ;;  %v3223_v3 = vld [vmem:[#allocation4 + $0x28] ss:$20 sps:$4 sm:$0xff]  }
  0x66   : > { %3691 = vsyncadd (%p4107_p7), [#allocation5], 4294934016  ;;  %715 = vmatprep.subr.bf16.mxu0 %v3218_v0  ;;  %v3221_v2 = vld [vmem:[#allocation4 + $0x2c] ss:$20 sps:$4 sm:$0xff]   ;;  %v3224_v4 = vld [vmem:[#allocation4 + $0x54] ss:$20 sps:$4 sm:$0xff]  }
  0x67   : > { %716 = vmatpush1.bf16.msra.mxu0 %v3220_v1  ;;  %v3226_v5 = vld [vmem:[#allocation4 + $0x50] ss:$20 sps:$4 sm:$0xff]   ;;  %v3229_v7 = vld [vmem:[#allocation4 + $0x78] ss:$20 sps:$4 sm:$0xff]   ;;  %v3232_v9 = vld [vmem:[#allocation4 + $0xa0] ss:$20 sps:$4 sm:$0xff]  }
  0x68   : > { %717 = vmatprep.subr.bf16.mxu0 %v3221_v2  ;;  %v3227_v6 = vld [vmem:[#allocation4 + $0x7c] ss:$20 sps:$4 sm:$0xff]   ;;  %v3230_v8 = vld [vmem:[#allocation4 + $0xa4] ss:$20 sps:$4 sm:$0xff]   ;;  %v3233_v10 = vld [vmem:[#allocation4 + $0xcc] ss:$20 sps:$4 sm:$0xff]  }
  0x69   : > { %v297_v11 = vld [vmem:[%s257_s11 + $0x8] sm:$0xff]  ;;  %vm711_vm0 = vcmask 523264   ;;  %v3259_v18 = vld [vmem:[#allocation4 + $0x30] ss:$20 sps:$4 sm:$0xff]   ;;  %v3265_v26 = vld [vmem:[#allocation4 + $0x80] ss:$20 sps:$4 sm:$0xff]  }
  0x6a   : > { %v3910_v12 = vpack.c.bf16 %v297_v11, %v297_v11  ;;  %v3254_v13 = vld [vmem:[#allocation4 + $0xc] ss:$20 sps:$4 sm:$0xff]   ;;  %v3256_v14 = vld [vmem:[#allocation4 + $0x8] ss:$20 sps:$4 sm:$0xff]   ;;  %v3238_v20 = vld [vmem:[#allocation4 + $0xf0] ss:$20 sps:$4 sm:$0xff]  }
  0x6b   : > { %718 = vmatpush1.bf16.msra.mxu0 %v3223_v3  ;;  %v3257_v15 = vld [vmem:[#allocation4 + $0x34] ss:$20 sps:$4 sm:$0xff]   ;;  %756 = vmatprep.subr.bf16.mxu1 %v3254_v13  ;;  %v3260_v19 = vld [vmem:[#allocation4 + $0x5c] ss:$20 sps:$4 sm:$0xff]   ;;  %v3262_v22 = vld [vmem:[#allocation4 + $0x58] ss:$20 sps:$4 sm:$0xff]  }
  0x6c   : > { %719 = vmatprep.subr.bf16.mxu0 %v3224_v4  ;;  %v3235_v16 = vld [vmem:[#allocation4 + $0xc8] ss:$20 sps:$4 sm:$0xff]   ;;  %2852 = vmatprep.mubr.msk.bf16.mxu0 %vm711_vm0, %v3910_v12  ;;  %v3263_v23 = vld [vmem:[#allocation4 + $0x84] ss:$20 sps:$4 sm:$0xff]   ;;  %v3266_v27 = vld [vmem:[#allocation4 + $0xac] ss:$20 sps:$4 sm:$0xff]  }
  0x6d   : > { %v3236_v17 = vld [vmem:[#allocation4 + $0xf4] ss:$20 sps:$4 sm:$0xff]   ;;  %757 = vmatpush1.bf16.msra.mxu1 %v3256_v14  ;;  %2853 = vmatprep.mubr.msk.bf16.mxu1 %vm711_vm0, %v3910_v12  ;;  %v3239_v21 = vld [vmem:[#allocation4 + $0x11c] ss:$20 sps:$4 sm:$0xff]   ;;  %v3241_v24 = vld [vmem:[#allocation4 + $0x118] ss:$20 sps:$4 sm:$0xff]  }
  0x6e   : > { %758 = vmatprep.subr.bf16.mxu1 %v3257_v15  ;;  %v3242_v25 = vld [vmem:[#allocation4 + $0x144] ss:$20 sps:$4 sm:$0xff]   ;;  %v3244_v28 = vld [vmem:[#allocation4 + $0x140] ss:$20 sps:$4 sm:$0xff]   ;;  %v3268_v30 = vld [vmem:[#allocation4 + $0xa8] ss:$20 sps:$4 sm:$0xff]  }
  0x6f   : > { %720 = vmatpush1.bf16.msra.mxu0 %v3226_v5  ;;  %v3245_v29 = vld [vmem:[#allocation4 + $0x16c] ss:$20 sps:$4 sm:$0xff]   ;;  %v3269_v31 = vld [vmem:[#allocation4 + $0xd4] ss:$20 sps:$4 sm:$0xff]   ;;  %v3271_v34 = vld [vmem:[#allocation4 + $0xd0] ss:$20 sps:$4 sm:$0xff]  }
  0x70   : > { %721 = vmatprep.subr.bf16.mxu0 %v3227_v6  ;;  %v3247_v32 = vld [vmem:[#allocation4 + $0x168] ss:$20 sps:$4 sm:$0xff]   ;;  %v3250_v36 = vld [vmem:[#allocation4 + $0x190] ss:$20 sps:$4 sm:$0xff]   ;;  %v3253_v38 = vld [vmem:[#allocation4 + $0x1b8] ss:$20 sps:$4 sm:$0xff]  }
  0x71   : > { %759 = vmatpush1.bf16.msra.mxu1 %v3259_v18  ;;  %v3248_v33 = vld [vmem:[#allocation4 + $0x194] ss:$20 sps:$4 sm:$0xff]   ;;  %v3272_v35 = vld [vmem:[#allocation4 + $0xfc] ss:$20 sps:$4 sm:$0xff]   ;;  %v3274_v39 = vld [vmem:[#allocation4 + $0xf8] ss:$20 sps:$4 sm:$0xff]  }
  0x72   : > { %760 = vmatprep.subr.bf16.mxu1 %v3260_v19  ;;  %v3251_v37 = vld [vmem:[#allocation4 + $0x1bc] ss:$20 sps:$4 sm:$0xff]   ;;  %v3275_v40 = vld [vmem:[#allocation4 + $0x124] ss:$20 sps:$4 sm:$0xff]   ;;  %v3277_v42 = vld [vmem:[#allocation4 + $0x120] ss:$20 sps:$4 sm:$0xff]  }
  0x73   : > { %722 = vmatpush1.bf16.msra.mxu0 %v3229_v7  ;;  %v296_v41 = vld [vmem:[%s257_s11] sm:$0xff]  ;;  %v3713_v46 = vmov 0   ;;  %v3280_v47 = vld [vmem:[#allocation4 + $0x148] ss:$20 sps:$4 sm:$0xff]   ;;  %v3285_v49 = vld [vmem:[#allocation4 + $0x38] ss:$20 sps:$4 sm:$0xff]  }
  0x74   : > { %723 = vmatprep.subr.bf16.mxu0 %v3230_v8  ;;  %v3918_v43 = vpack.c.bf16 %v296_v41, %v296_v41  ;;  %v3278_v44 = vld [vmem:[#allocation4 + $0x14c] ss:$20 sps:$4 sm:$0xff]   ;;  %v3281_v45 = vld [vmem:[#allocation4 + $0x10] ss:$20 sps:$4 sm:$0xff]   ;;  %v3282_v48 = vld [vmem:[#allocation4 + $0x174] ss:$20 sps:$4 sm:$0xff]  }
  0x75   : > { %761 = vmatpush1.bf16.msra.mxu1 %v3262_v22  ;;  %v3284_v50 = vld [vmem:[#allocation4 + $0x170] ss:$20 sps:$4 sm:$0xff]   ;;  %v3289_v52 = vld [vmem:[#allocation4 + $0x60] ss:$20 sps:$4 sm:$0xff]   ;;  %v3288_v53 = vld [vmem:[#allocation4 + $0x198] ss:$20 sps:$4 sm:$0xff]  }
  0x76   : > { %762 = vmatprep.subr.bf16.mxu1 %v3263_v23  ;;  %v3286_v51 = vld [vmem:[#allocation4 + $0x19c] ss:$20 sps:$4 sm:$0xff]   ;;  %v3290_v54 = vld [vmem:[#allocation4 + $0x1c4] ss:$20 sps:$4 sm:$0xff]   ;;  %v3292_v56 = vld [vmem:[#allocation4 + $0x1c0] ss:$20 sps:$4 sm:$0xff]  }
  0x77   : > { %724 = vmatpush1.bf16.msra.mxu0 %v3232_v9  ;;  %v3293_v55 = vld [vmem:[#allocation4 + $0x88] ss:$20 sps:$4 sm:$0xff]   ;;  %v3304_v57 = vld [vmem:[#allocation6 + $0x4] ss:$20 sps:$4 sm:$0xff]   ;;  %v3302_v59 = vld [vmem:[#allocation6] ss:$20 sps:$4 sm:$0xff]  }
  0x78   : > { %725 = vmatprep.subr.bf16.mxu0 %v3233_v10  ;;  %v3294_v58 = vld [vmem:[#allocation4 + $0xb0] ss:$20 sps:$4 sm:$0xff]   ;;  %v3310_v60 = vld [vmem:[#allocation6 + $0x2c] ss:$20 sps:$4 sm:$0xff]   ;;  %v3308_v62 = vld [vmem:[#allocation6 + $0x28] ss:$20 sps:$4 sm:$0xff]  }
  0x79   : > { %763 = vmatpush1.bf16.msra.mxu1 %v3265_v26  ;;  %v3295_v61 = vld [vmem:[#allocation4 + $0xd8] ss:$20 sps:$4 sm:$0xff]   ;;  %v3316_v63 = vld [vmem:[#allocation6 + $0x54] ss:$20 sps:$4 sm:$0xff]   ;;  %v3314_v1 = vld [vmem:[#allocation6 + $0x50] ss:$20 sps:$4 sm:$0xff]  }
  0x7a   : > { %764 = vmatprep.subr.bf16.mxu1 %v3266_v27  ;;  %v3296_v0 = vld [vmem:[#allocation4 + $0x100] ss:$20 sps:$4 sm:$0xff]   ;;  %v3322_v2 = vld [vmem:[#allocation6 + $0x7c] ss:$20 sps:$4 sm:$0xff]   ;;  %v3320_v4 = vld [vmem:[#allocation6 + $0x78] ss:$20 sps:$4 sm:$0xff]  }
  0x7b   : > { %726 = vmatpush1.bf16.msra.mxu0 %v3235_v16  ;;  %v3297_v3 = vld [vmem:[#allocation4 + $0x128] ss:$20 sps:$4 sm:$0xff]   ;;  %v3328_v5 = vld [vmem:[#allocation6 + $0xa4] ss:$20 sps:$4 sm:$0xff]   ;;  %v3326_v8 = vld [vmem:[#allocation6 + $0xa0] ss:$20 sps:$4 sm:$0xff]  }
  0x7c   : > { %727 = vmatprep.subr.bf16.mxu0 %v3236_v17  ;;  %v3298_v6 = vld [vmem:[#allocation4 + $0x150] ss:$20 sps:$4 sm:$0xff]   ;;  %v3299_v7 = vld [vmem:[#allocation4 + $0x178] ss:$20 sps:$4 sm:$0xff]   ;;  %v3332_v10 = vld [vmem:[#allocation6 + $0xc8] ss:$20 sps:$4 sm:$0xff]  }
  0x7d   : > { %765 = vmatpush1.bf16.msra.mxu1 %v3268_v30  ;;  %v3334_v9 = vld [vmem:[#allocation6 + $0xcc] ss:$20 sps:$4 sm:$0xff]   ;;  %v3340_v11 = vld [vmem:[#allocation6 + $0xf4] ss:$20 sps:$4 sm:$0xff]   ;;  %v3338_v13 = vld [vmem:[#allocation6 + $0xf0] ss:$20 sps:$4 sm:$0xff]  }
  0x7e   : > { %766 = vmatprep.subr.bf16.mxu1 %v3269_v31  ;;  %v3346_v14 = vld [vmem:[#allocation6 + $0x11c] ss:$20 sps:$4 sm:$0xff]   ;;  %v3307_v16 = vld [vmem:[#allocation6 + $0xc] ss:$20 sps:$4 sm:$0xff]   ;;  %v3352_v18 = vld [vmem:[#allocation6 + $0x144] ss:$20 sps:$4 sm:$0xff]  }
  0x7f   : > { %728 = vmatpush1.bf16.msra.mxu0 %v3238_v20  ;;  %v3301_v15 = vld [vmem:[#allocation4 + $0x1c8] ss:$20 sps:$4 sm:$0xff]   ;;  %v3344_v17 = vld [vmem:[#allocation6 + $0x118] ss:$20 sps:$4 sm:$0xff]   ;;  %v3311_v23 = vld [vmem:[#allocation6 + $0x30] ss:$20 sps:$4 sm:$0xff]  }
  0x80   : > { %729 = vmatprep.subr.bf16.mxu0 %v3239_v21  ;;  %v3305_v19 = vld [vmem:[#allocation6 + $0x8] ss:$20 sps:$4 sm:$0xff]   ;;  %v3350_v21 = vld [vmem:[#allocation6 + $0x140] ss:$20 sps:$4 sm:$0xff]   ;;  %v3317_v27 = vld [vmem:[#allocation6 + $0x58] ss:$20 sps:$4 sm:$0xff]  }
  0x81   : > { %767 = vmatpush1.bf16.msra.mxu1 %v3271_v34  ;;  %v3313_v20 = vld [vmem:[#allocation6 + $0x34] ss:$20 sps:$4 sm:$0xff]   ;;  %v3358_v22 = vld [vmem:[#allocation6 + $0x16c] ss:$20 sps:$4 sm:$0xff]   ;;  %v3370_v30 = vld [vmem:[#allocation6 + $0x1bc] ss:$20 sps:$4 sm:$0xff]  }
  0x82   : > { %768 = vmatprep.subr.bf16.mxu1 %v3272_v35  ;;  %v3364_v26 = vld [vmem:[#allocation6 + $0x194] ss:$20 sps:$4 sm:$0xff]   ;;  %v3376_v34 = vld [vmem:[#allocation6 + $0x1e4] ss:$20 sps:$4 sm:$0xff]   ;;  %vm3715_vm1 = vmmov 0   ;;  %vm2597_vm2 = vcmask 1040384  }
  0x83   : > { %730 = vmatpush1.bf16.msra.mxu0 %v3241_v24  ;;  %v3319_v24 = vld [vmem:[#allocation6 + $0x5c] ss:$20 sps:$4 sm:$0xff]   ;;  %v3323_v31 = vld [vmem:[#allocation6 + $0x80] ss:$20 sps:$4 sm:$0xff]   ;;  %p292_p6 = scmp.lt.s32.totalorder %s3770_s25, 2  ;;  %vm2609_vm3 = vcmask 0  }
  0x84   : > { %731 = vmatprep.subr.bf16.mxu0 %v3242_v25  ;;  %v3356_v25 = vld [vmem:[#allocation6 + $0x168] ss:$20 sps:$4 sm:$0xff]   ;;  %p3055_p9 = scmp.ne.s32.totalorder %s3770_s25, 2 }
  0x85   : > { %769 = vmatpush1.bf16.msra.mxu1 %v3274_v39  ;;  %v3329_v35 = vld [vmem:[#allocation6 + $0xa8] ss:$20 sps:$4 sm:$0xff]   ;;  %v3335_v39 = vld [vmem:[#allocation6 + $0xd0] ss:$20 sps:$4 sm:$0xff]   ;;  %s293_s12 = scalar_select %p292_p6, %s3770_s25, 2 }
  0x86   : > { %770 = vmatprep.subr.bf16.mxu1 %v3275_v40  ;;  %v3343_v40 = vld [vmem:[#allocation6 + $0xfc] ss:$20 sps:$4 sm:$0xff]   ;;  %s3056_s16 = sshll.u32 (!%p3055_p9), %s3770_s25, 3 }
  0x87   : > { %732 = vmatpush1.bf16.msra.mxu0 %v3244_v28  ;;  %v3325_v28 = vld [vmem:[#allocation6 + $0x84] ss:$20 sps:$4 sm:$0xff]   ;;  %v3380_v41 = vld [vmem:[#allocation6 + $0x208] ss:$20 sps:$4 sm:$0xff]   ;;  %s4051_s14 = scalar_lea.vmem %s4096_s6, %s293_s12 }
  0x88   : > { %733 = vmatprep.subr.bf16.mxu0 %v3245_v29  ;;  %v3362_v29 = vld [vmem:[#allocation6 + $0x190] ss:$20 sps:$4 sm:$0xff]  }
  0x89   : > { %771 = vmatpush1.bf16.msra.mxu1 %v3277_v42  ;;  %v3341_v42 = vld [vmem:[#allocation6 + $0xf8] ss:$20 sps:$4 sm:$0xff]  }
  0x8a   : > { %772 = vmatprep.subr.bf16.mxu1 %v3278_v44  ;;  %v3347_v44 = vld [vmem:[#allocation6 + $0x120] ss:$20 sps:$4 sm:$0xff]  }
  0x8b   : > { %734 = vmatpush1.bf16.msra.mxu0 %v3247_v32  ;;  %v3331_v32 = vld [vmem:[#allocation6 + $0xac] ss:$20 sps:$4 sm:$0xff]  }
  0x8c   : > { %735 = vmatprep.subr.bf16.mxu0 %v3248_v33  ;;  %v3368_v33 = vld [vmem:[#allocation6 + $0x1b8] ss:$20 sps:$4 sm:$0xff]  }
  0x8d   : > { %773 = vmatpush1.bf16.msra.mxu1 %v3280_v47  ;;  %v3353_v47 = vld [vmem:[#allocation6 + $0x148] ss:$20 sps:$4 sm:$0xff]  }
  0x8e   : > { %774 = vmatprep.subr.bf16.mxu1 %v3282_v48  ;;  %v3361_v48 = vld [vmem:[#allocation6 + $0x174] ss:$20 sps:$4 sm:$0xff]  }
  0x8f   : > { %736 = vmatpush1.bf16.msra.mxu0 %v3250_v36  ;;  %v3337_v36 = vld [vmem:[#allocation6 + $0xd4] ss:$20 sps:$4 sm:$0xff]  }
  0x90   : > { %737 = vmatprep.subr.bf16.mxu0 %v3251_v37  ;;  %v3374_v37 = vld [vmem:[#allocation6 + $0x1e0] ss:$20 sps:$4 sm:$0xff]  }
  0x91   : > { %775 = vmatpush1.bf16.msra.mxu1 %v3284_v50  ;;  %v3367_v50 = vld [vmem:[#allocation6 + $0x19c] ss:$20 sps:$4 sm:$0xff]  }
  0x92   : > { %776 = vmatprep.subr.bf16.mxu1 %v3286_v51  ;;  %v3365_v51 = vld [vmem:[#allocation6 + $0x198] ss:$20 sps:$4 sm:$0xff]  }
  0x93   : > { %738 = vmatpush1.bf16.msra.mxu0 %v3253_v38  ;;  %v3382_v38 = vld [vmem:[#allocation6 + $0x20c] ss:$20 sps:$4 sm:$0xff]  }
  0x94   : > { %797 = vmatprep.subr.bf16.mxu0 %v3713_v46 }
  0x95   : > { %777 = vmatpush1.bf16.msra.mxu1 %v3288_v53  ;;  %v3373_v53 = vld [vmem:[#allocation6 + $0x1c4] ss:$20 sps:$4 sm:$0xff]  }
  0x96   : > { %748 = vmatmul.mubr.bf16.vlgmr.msra.gmra.mrb[0].mxu0 %v3918_v43  ;;  %778 = vmatprep.subr.bf16.mxu1 %v3290_v54  ;;  %v3386_v54 = vld [vmem:[#allocation6 + $0x230] ss:$20 sps:$4 sm:$0xff]  }
  0x97   : > { %798 = vmatpush1.bf16.msra.mxu0 %v3281_v45  ;;  %2854 = vmatprep.mubr.msk.bf16.mxu0 %vm711_vm0, %v3910_v12  ;;  %v3300_v12 = vld [vmem:[#allocation4 + $0x1a0] ss:$20 sps:$4 sm:$0xff]  }
  0x98   : > { %799 = vmatprep.subr.bf16.mxu0 %v3713_v46  ;;  %v3355_v45 = vld [vmem:[#allocation6 + $0x14c] ss:$20 sps:$4 sm:$0xff]  }
  0x99   : > { %779 = vmatpush1.bf16.msra.mxu1 %v3292_v56  ;;  %v3394_v56 = vld [vmem:[#allocation6 + $0x25c] ss:$20 sps:$4 sm:$0xff]  }
  0x9a   : > { %2159 = vmatprep.subr.bf16.mxu1 %v3304_v57  ;;  %v3379_v57 = vld [vmem:[#allocation6 + $0x1ec] ss:$20 sps:$4 sm:$0xff]  }
  0x9b   : > { %800 = vmatpush1.bf16.msra.mxu0 %v3285_v49  ;;  %v3359_v49 = vld [vmem:[#allocation6 + $0x170] ss:$20 sps:$4 sm:$0xff]  }
  0x9c   : > { %801 = vmatprep.subr.bf16.mxu0 %v3713_v46  ;;  %789 = vmatmul.mubr.bf16.vlgmr.msra.gmra.mrb[0].mxu1 %v3918_v43 }
  0x9d   : > { %2160 = vmatpush1.bf16.msra.mxu1 %v3302_v59  ;;  %v3400_v59 = vld [vmem:[#allocation6 + $0x284] ss:$20 sps:$4 sm:$0xff]  }
  0x9e   : > { %2161 = vmatprep.subr.bf16.mxu1 %v3310_v60  ;;  %v3377_v60 = vld [vmem:[#allocation6 + $0x1e8] ss:$20 sps:$4 sm:$0xff]  }
  0x9f   : > { %802 = vmatpush1.bf16.msra.mxu0 %v3289_v52  ;;  %v3388_v52 = vld [vmem:[#allocation6 + $0x234] ss:$20 sps:$4 sm:$0xff]  }
  0xa0   : > { %803 = vmatprep.subr.bf16.mxu0 %v3713_v46 }
  0xa1   : > { %2162 = vmatpush1.bf16.msra.mxu1 %v3308_v62  ;;  %v3383_v62 = vld [vmem:[#allocation6 + $0x210] ss:$20 sps:$4 sm:$0xff]  }
  0xa2   : > { %2163 = vmatprep.subr.bf16.mxu1 %v3316_v63  ;;  %v3391_v63 = vld [vmem:[#allocation6 + $0x23c] ss:$20 sps:$4 sm:$0xff]  }
  0xa3   : > { %804 = vmatpush1.bf16.msra.mxu0 %v3293_v55  ;;  %v3371_v55 = vld [vmem:[#allocation6 + $0x1c0] ss:$20 sps:$4 sm:$0xff]  }
  0xa4   : > { %805 = vmatprep.subr.bf16.mxu0 %v3713_v46 }
  0xa5   : > { %2164 = vmatpush1.bf16.msra.mxu1 %v3314_v1  ;;  %v3397_v1 = vld [vmem:[#allocation6 + $0x264] ss:$20 sps:$4 sm:$0xff]  }
  0xa6   : > { %2165 = vmatprep.subr.bf16.mxu1 %v3322_v2  ;;  %v3395_v2 = vld [vmem:[#allocation6 + $0x260] ss:$20 sps:$4 sm:$0xff]  }
  0xa7   : > { %806 = vmatpush1.bf16.msra.mxu0 %v3294_v58  ;;  %v3392_v58 = vld [vmem:[#allocation6 + $0x258] ss:$20 sps:$4 sm:$0xff]  }
  0xa8   : > { %807 = vmatprep.subr.bf16.mxu0 %v3713_v46 }
  0xa9   : > { %2166 = vmatpush1.bf16.msra.mxu1 %v3320_v4  ;;  %v374_v4 = vlaneseq }
  0xaa   : > { %2167 = vmatprep.subr.bf16.mxu1 %v3328_v5 }
  0xab   : > { %808 = vmatpush1.bf16.msra.mxu0 %v3295_v61  ;;  %v3385_v61 = vld [vmem:[#allocation6 + $0x214] ss:$20 sps:$4 sm:$0xff]   ;;  %v3937_v5 = vshrl.u32 %v374_v4, 7  ;;  %v3454_v4 = vld [vmem:[#allocation6 + $0x3ec] ss:$20 sps:$4 sm:$0xff]  }
  0xac   : > { %809 = vmatprep.subr.bf16.mxu0 %v3713_v46 }
  0xad   : > { %2168 = vmatpush1.bf16.msra.mxu1 %v3326_v8  ;;  %v3948_v8 = vsub.s32 1, %v3937_v5 }
  0xae   : > { %2169 = vmatprep.subr.bf16.mxu1 %v3334_v9 }
  0xaf   : > { %810 = vmatpush1.bf16.msra.mxu0 %v3296_v0  ;;  %v3389_v0 = vld [vmem:[#allocation6 + $0x238] ss:$20 sps:$4 sm:$0xff]  }
  0xb0   : > { %811 = vmatprep.subr.bf16.mxu0 %v3713_v46 }
  0xb1   : > { %2170 = vmatpush1.bf16.msra.mxu1 %v3332_v10 }
  0xb2   : > { %2171 = vmatprep.subr.bf16.mxu1 %v3340_v11 }
  0xb3   : > { %812 = vmatpush1.bf16.msra.mxu0 %v3297_v3  ;;  %v3403_v3 = vld [vmem:[#allocation6 + $0x28c] ss:$20 sps:$4 sm:$0xff]  }
  0xb4   : > { %813 = vmatprep.subr.bf16.mxu0 %v3713_v46 }
  0xb5   : > { %2172 = vmatpush1.bf16.msra.mxu1 %v3338_v13 }
  0xb6   : > { %2173 = vmatprep.subr.bf16.mxu1 %v3346_v14 }
  0xb7   : > { %814 = vmatpush1.bf16.msra.mxu0 %v3298_v6  ;;  %v3940_v6 = vsub.s32 0, %v3937_v5 }
  0xb8   : > { %815 = vmatprep.subr.bf16.mxu0 %v3713_v46 }
  0xb9   : > { %2174 = vmatpush1.bf16.msra.mxu1 %v3344_v17 }
  0xba   : > { %2175 = vmatprep.subr.bf16.mxu1 %v3352_v18 }
  0xbb   : > { %816 = vmatpush1.bf16.msra.mxu0 %v3299_v7  ;;  %v3945_v7 = vld [vmem:[%s4092_s2] sm:$0x1f] }
  0xbc   : > { %817 = vmatprep.subr.bf16.mxu0 %v3713_v46  ;;  %v377_v9 = vrot.slane %v3945_v7, %v3940_v6  ;;  %v381_v10 = vrot.slane %v3945_v7, %v3948_v8 }
  0xbd   : > { %2176 = vmatpush1.bf16.msra.mxu1 %v3350_v21 }
  0xbe   : > { %2177 = vmatprep.subr.bf16.mxu1 %v3358_v22  ;;  %v3398_v22 = vld [vmem:[#allocation6 + $0x280] ss:$20 sps:$4 sm:$0xff]  }
  0xbf   : > { %818 = vmatpush1.bf16.msra.mxu0 %v3300_v12 }
  0xc0   : > { %819 = vmatprep.subr.bf16.mxu0 %v3713_v46 }
  0xc1   : > { %2178 = vmatpush1.bf16.msra.mxu1 %v3356_v25  ;;  %v3406_v25 = vld [vmem:[#allocation6 + $0x2ac] ss:$20 sps:$4 sm:$0xff]  }
  0xc2   : > { %2179 = vmatprep.subr.bf16.mxu1 %v3364_v26  ;;  %v3409_v26 = vld [vmem:[#allocation6 + $0x2b4] ss:$20 sps:$4 sm:$0xff]  }
  0xc3   : > { %820 = vmatpush1.bf16.msra.mxu0 %v3301_v15 }
  0xc4   : > { %2282 = vmatprep.subr.bf16.mxu0 %v3307_v16 }
  0xc5   : > { %2180 = vmatpush1.bf16.msra.mxu1 %v3362_v29  ;;  %v3963_v29 = vsub.s32 3, %v3937_v5 }
  0xc6   : > { %830 = vmatmul.mubr.bf16.vlgmr.msra.gmra.mrb[4].mxu0 %v3918_v43  ;;  %2181 = vmatprep.subr.bf16.mxu1 %v3370_v30  ;;  %v3349_v43 = vld [vmem:[#allocation6 + $0x124] ss:$20 sps:$4 sm:$0xff]   ;;  %v3412_v30 = vld [vmem:[#allocation6 + $0x2d4] ss:$20 sps:$4 sm:$0xff]  }
  0xc7   : > { %2283 = vmatpush1.bf16.msra.mxu0 %v3305_v19 }
  0xc8   : > { %2284 = vmatprep.subr.bf16.mxu0 %v3313_v20 }
  0xc9   : > { %2182 = vmatpush1.bf16.msra.mxu1 %v3368_v33  ;;  %v3413_v33 = vld [vmem:[#allocation6 + $0x2d8] ss:$20 sps:$4 sm:$0xff]  }
  0xca   : > { %2183 = vmatprep.subr.bf16.mxu1 %v3376_v34  ;;  %v389_v34 = vrot.slane %v3945_v7, %v3963_v29 }
  0xcb   : > { %2285 = vmatpush1.bf16.msra.mxu0 %v3311_v23  ;;  %v3401_v23 = vld [vmem:[#allocation6 + $0x288] ss:$20 sps:$4 sm:$0xff]  }
  0xcc   : > { %2286 = vmatprep.subr.bf16.mxu0 %v3319_v24 }
  0xcd   : > { %2184 = vmatpush1.bf16.msra.mxu1 %v3374_v37 }
  0xce   : > { %2185 = vmatprep.subr.bf16.mxu1 %v3382_v38 }
  0xcf   : > { %2287 = vmatpush1.bf16.msra.mxu0 %v3317_v27  ;;  %v3404_v27 = vld [vmem:[#allocation6 + $0x2a8] ss:$20 sps:$4 sm:$0xff]  }
  0xd0   : > { %2288 = vmatprep.subr.bf16.mxu0 %v3325_v28  ;;  %v3407_v28 = vld [vmem:[#allocation6 + $0x2b0] ss:$20 sps:$4 sm:$0xff]  }
  0xd1   : > { %2186 = vmatpush1.bf16.msra.mxu1 %v3380_v41 }
  0xd2   : > { %2187 = vmatprep.subr.bf16.mxu1 %v3388_v52  ;;  %v3433_v52 = vld [vmem:[#allocation6 + $0x354] ss:$20 sps:$4 sm:$0xff]  }
  0xd3   : > { %2289 = vmatpush1.bf16.msra.mxu0 %v3323_v31  ;;  %v3415_v31 = vld [vmem:[#allocation6 + $0x2dc] ss:$20 sps:$4 sm:$0xff]  }
  0xd4   : > { %2290 = vmatprep.subr.bf16.mxu0 %v3331_v32  ;;  %v3410_v32 = vld [vmem:[#allocation6 + $0x2d0] ss:$20 sps:$4 sm:$0xff]  }
  0xd5   : > { %2188 = vmatpush1.bf16.msra.mxu1 %v3386_v54  ;;  %v3428_v54 = vld [vmem:[#allocation6 + $0x348] ss:$20 sps:$4 sm:$0xff]  }
  0xd6   : > { %2189 = vmatprep.subr.bf16.mxu1 %v3394_v56  ;;  %v3436_v56 = vld [vmem:[#allocation6 + $0x374] ss:$20 sps:$4 sm:$0xff]  }
  0xd7   : > { %2291 = vmatpush1.bf16.msra.mxu0 %v3329_v35  ;;  %v3418_v35 = vld [vmem:[#allocation6 + $0x2fc] ss:$20 sps:$4 sm:$0xff]  }
  0xd8   : > { %2292 = vmatprep.subr.bf16.mxu0 %v3337_v36  ;;  %v3421_v36 = vld [vmem:[#allocation6 + $0x304] ss:$20 sps:$4 sm:$0xff]  }
  0xd9   : > { %2190 = vmatpush1.bf16.msra.mxu1 %v3392_v58  ;;  %v3434_v58 = vld [vmem:[#allocation6 + $0x370] ss:$20 sps:$4 sm:$0xff]  }
  0xda   : > { %2200 = vmatprep.subr.bf16.mxu1 %v3400_v59  ;;  %v3437_v59 = vld [vmem:[#allocation6 + $0x378] ss:$20 sps:$4 sm:$0xff]  }
  0xdb   : > { %2293 = vmatpush1.bf16.msra.mxu0 %v3335_v39  ;;  %v3416_v39 = vld [vmem:[#allocation6 + $0x2f8] ss:$20 sps:$4 sm:$0xff]  }
  0xdc   : > { %2294 = vmatprep.subr.bf16.mxu0 %v3343_v40  ;;  %v3419_v40 = vld [vmem:[#allocation6 + $0x300] ss:$20 sps:$4 sm:$0xff]  }
  0xdf   : > { %2295 = vmatpush1.bf16.msra.mxu0 %v3341_v42 }
  0xe0   : > { %2296 = vmatprep.subr.bf16.mxu0 %v3349_v43  ;;  %v3424_v43 = vld [vmem:[#allocation6 + $0x324] ss:$20 sps:$4 sm:$0xff]  }
  0xe3   : > { %2297 = vmatpush1.bf16.msra.mxu0 %v3347_v44  ;;  %v3427_v44 = vld [vmem:[#allocation6 + $0x32c] ss:$20 sps:$4 sm:$0xff]  }
  0xe4   : > { %2298 = vmatprep.subr.bf16.mxu0 %v3355_v45 }
  0xe7   : > { %2299 = vmatpush1.bf16.msra.mxu0 %v3353_v47 }
  0xe8   : > { %2300 = vmatprep.subr.bf16.mxu0 %v3361_v48  ;;  %v3422_v48 = vld [vmem:[#allocation6 + $0x320] ss:$20 sps:$4 sm:$0xff]  }
  0xeb   : > { %2301 = vmatpush1.bf16.msra.mxu0 %v3359_v49  ;;  %v3425_v49 = vld [vmem:[#allocation6 + $0x328] ss:$20 sps:$4 sm:$0xff]  }
  0xec   : > { %2302 = vmatprep.subr.bf16.mxu0 %v3367_v50 }
  0xef   : > { %2303 = vmatpush1.bf16.msra.mxu0 %v3365_v51  ;;  %v3430_v51 = vld [vmem:[#allocation6 + $0x34c] ss:$20 sps:$4 sm:$0xff]  }
  0xf0   : > { %2304 = vmatprep.subr.bf16.mxu0 %v3373_v53 }
  0xf3   : > { %2305 = vmatpush1.bf16.msra.mxu0 %v3371_v55  ;;  %v3431_v55 = vld [vmem:[#allocation6 + $0x350] ss:$20 sps:$4 sm:$0xff]  }
  0xf4   : > { %2306 = vmatprep.subr.bf16.mxu0 %v3379_v57  ;;  %v3439_v57 = vld [vmem:[#allocation6 + $0x37c] ss:$20 sps:$4 sm:$0xff]  }
  0xf7   : > { %2307 = vmatpush1.bf16.msra.mxu0 %v3377_v60  ;;  %v3442_v60 = vld [vmem:[#allocation6 + $0x39c] ss:$20 sps:$4 sm:$0xff]  }
  0xf8   : > { %2308 = vmatprep.subr.bf16.mxu0 %v3385_v61  ;;  %v3445_v61 = vld [vmem:[#allocation6 + $0x3a4] ss:$20 sps:$4 sm:$0xff]  }
  0xfb   : > { %2309 = vmatpush1.bf16.msra.mxu0 %v3383_v62  ;;  %v3440_v62 = vld [vmem:[#allocation6 + $0x398] ss:$20 sps:$4 sm:$0xff]  }
  0xfc   : > { %2310 = vmatprep.subr.bf16.mxu0 %v3391_v63  ;;  %v3443_v63 = vld [vmem:[#allocation6 + $0x3a0] ss:$20 sps:$4 sm:$0xff]  }
  0xff   : > { %2311 = vmatpush1.bf16.msra.mxu0 %v3389_v0  ;;  %v3448_v0 = vld [vmem:[#allocation6 + $0x3c4] ss:$20 sps:$4 sm:$0xff]  }
 0x100   : > { %2312 = vmatprep.subr.bf16.mxu0 %v3397_v1  ;;  %v3451_v1 = vld [vmem:[#allocation6 + $0x3cc] ss:$20 sps:$4 sm:$0xff]  }
 0x103   : > { %2313 = vmatpush1.bf16.msra.mxu0 %v3395_v2  ;;  %v3446_v2 = vld [vmem:[#allocation6 + $0x3c0] ss:$20 sps:$4 sm:$0xff]  }
 0x104   : > { %2323 = vmatprep.subr.bf16.mxu0 %v3403_v3  ;;  %v3449_v3 = vld [vmem:[#allocation6 + $0x3c8] ss:$20 sps:$4 sm:$0xff]  }
 0x169   : > { %v749_v11 = vpop.f32.mrb[0].mxu0 }
 0x16a   : > { %v750_v12 = vadd.f32 %v749_v11, %v377_v9  ;;  %v751_v13 = vpop.f32.mrb[1].mxu0  ;;  %v3457_v9 = vld [vmem:[#allocation6 + $0x3f4] ss:$20 sps:$4 sm:$0xff]   ;;  %v3455_v11 = vld [vmem:[#allocation6 + $0x3f0] ss:$20 sps:$4 sm:$0xff]  }
 0x16b   : > { %v752_v14 = vadd.f32 %v751_v13, %v381_v10  ;;  %v753_v15 = vpop.f32.mrb[2].mxu0  ;;  %v3452_v10 = vld [vmem:[#allocation6 + $0x3e8] ss:$20 sps:$4 sm:$0xff]  }
 0x16c   : > { %v837_v16 = vmul.f32 0.01, %v750_v12  ;;  %v754_v17 = vpop.f32.mrb[3].mxu0  ;;  %v3463_v13 = vld [vmem:[#allocation6 + $0x41c] ss:$20 sps:$4 sm:$0xff]  }
 0x16d   : > { %v838_v18 = vmul.f32 0.01, %v752_v14  ;;  %v3461_v15 = vld [vmem:[#allocation6 + $0x418] ss:$20 sps:$4 sm:$0xff]   ;;  %v3466_v17 = vld [vmem:[#allocation6 + $0x43c] ss:$20 sps:$4 sm:$0xff]  }
 0x16e   : > { %v842_v19 = vmax.f32 %v750_v12, %v837_v16  ;;  %v3460_v12 = vld [vmem:[#allocation6 + $0x414] ss:$20 sps:$4 sm:$0xff]  }
 0x16f   : > { %v843_v20 = vmax.f32 %v752_v14, %v838_v18  ;;  %v3967_v37 = vpop.f32.mrb[0].mxu1  ;;  %v3458_v14 = vld [vmem:[#allocation6 + $0x410] ss:$20 sps:$4 sm:$0xff]  }
 0x170   : > { %v3956_v24 = vpack.c.bf16 %v842_v19, %v842_v19  ;;  %v792_v38 = vpop.f32.mrb[1].mxu1  ;;  %v3469_v18 = vld [vmem:[#allocation6 + $0x444] ss:$20 sps:$4 sm:$0xff]  }
 0x171   : > { %v3954_v21 = vpack.c.bf16 %v843_v20, %v843_v20  ;;  %v793_v41 = vadd.f32 %v792_v38, %v389_v34  ;;  %v794_v42 = vpop.f32.mrb[2].mxu1  ;;  %v3481_v34 = vld [vmem:[#allocation6 + $0x494] ss:$20 sps:$4 sm:$0xff]  }
 0x172   : > { %v795_v45 = vpop.f32.mrb[3].mxu1  ;;  %v3485_v42 = vld [vmem:[#allocation6 + $0x4b8] ss:$20 sps:$4 sm:$0xff]  }
 0x173   : > { %2191 = vmatprep.mubr.bf16.mxu1 %v3954_v21  ;;  %2314 = vmatprep.mubr.bf16.mxu0 %v3954_v21  ;;  %v840_v47 = vmul.f32 0.01, %v793_v41  ;;  %v3493_v45 = vld [vmem:[#allocation6 + $0x4e4] ss:$20 sps:$4 sm:$0xff]  }
 0x174   : > { %2192 = vmatmul.mubr.bf16.vlgmr.msra.gmra.mrb[4].mxu1 %v3956_v24  ;;  %2315 = vmatmul.mubr.bf16.vlgmr.msra.gmra.mrb[8].mxu0 %v3956_v24 }
 0x175   : > { %2201 = vmatpush1.bf16.msra.mxu1 %v3398_v22  ;;  %2324 = vmatpush1.bf16.msra.mxu0 %v3401_v23  ;;  %v845_v50 = vmax.f32 %v793_v41, %v840_v47  ;;  %v3464_v23 = vld [vmem:[#allocation6 + $0x438] ss:$20 sps:$4 sm:$0xff]   ;;  %v3482_v41 = vld [vmem:[#allocation6 + $0x4b0] ss:$20 sps:$4 sm:$0xff]  }
 0x176   : > { %2202 = vmatprep.subr.bf16.mxu1 %v3406_v25  ;;  %2325 = vmatprep.subr.bf16.mxu0 %v3409_v26  ;;  %v3467_v25 = vld [vmem:[#allocation6 + $0x440] ss:$20 sps:$4 sm:$0xff]   ;;  %v3472_v26 = vld [vmem:[#allocation6 + $0x464] ss:$20 sps:$4 sm:$0xff]  }
 0x177   : > { %v3969_v53 = vpack.c.bf16 %v845_v50, %v845_v50  ;;  %v3488_v47 = vld [vmem:[#allocation6 + $0x4d8] ss:$20 sps:$4 sm:$0xff]  }
 0x178   : > { %v3499_v50 = vld [vmem:[#allocation6 + $0x50c] ss:$20 sps:$4 sm:$0xff]  }
 0x179   : > { %2203 = vmatpush1.bf16.msra.mxu1 %v3404_v27  ;;  %2326 = vmatpush1.bf16.msra.mxu0 %v3407_v28  ;;  %v3475_v27 = vld [vmem:[#allocation6 + $0x46c] ss:$20 sps:$4 sm:$0xff]   ;;  %v3976_v28 = vsub.s32 2, %v3937_v5 }
 0x17a   : > { %2204 = vmatprep.subr.bf16.mxu1 %v3412_v30  ;;  %2327 = vmatprep.subr.bf16.mxu0 %v3415_v31  ;;  %v3470_v30 = vld [vmem:[#allocation6 + $0x460] ss:$20 sps:$4 sm:$0xff]   ;;  %v3473_v31 = vld [vmem:[#allocation6 + $0x468] ss:$20 sps:$4 sm:$0xff]  }
 0x17b   : > { %2232 = vmatprep.mubr.bf16.mxu1 %v3969_v53  ;;  %2355 = vmatprep.mubr.bf16.mxu0 %v3969_v53 }
 0x17d   : > { %2205 = vmatpush1.bf16.msra.mxu1 %v3410_v32  ;;  %2328 = vmatpush1.bf16.msra.mxu0 %v3413_v33  ;;  %v385_v32 = vrot.slane %v3945_v7, %v3976_v28  ;;  %v3478_v33 = vld [vmem:[#allocation6 + $0x48c] ss:$20 sps:$4 sm:$0xff]  }
 0x17e   : > { %2206 = vmatprep.subr.bf16.mxu1 %v3418_v35  ;;  %2329 = vmatprep.subr.bf16.mxu0 %v3421_v36  ;;  %v3476_v35 = vld [vmem:[#allocation6 + $0x488] ss:$20 sps:$4 sm:$0xff]   ;;  %v3479_v36 = vld [vmem:[#allocation6 + $0x490] ss:$20 sps:$4 sm:$0xff]  }
 0x17f   : > { %v791_v38 = vadd.f32 %v3967_v37, %v385_v32  ;;  %v3496_v37 = vld [vmem:[#allocation6 + $0x504] ss:$20 sps:$4 sm:$0xff]  }
 0x180   : > { %v3543_v32 = vld [vmem:[#allocation6 + $0x10] ss:$20 sps:$4 sm:$0xff]  }
 0x181   : > { %2207 = vmatpush1.bf16.msra.mxu1 %v3416_v39  ;;  %2330 = vmatpush1.bf16.msra.mxu0 %v3419_v40  ;;  %v3484_v39 = vld [vmem:[#allocation6 + $0x4b4] ss:$20 sps:$4 sm:$0xff]   ;;  %v3487_v40 = vld [vmem:[#allocation6 + $0x4bc] ss:$20 sps:$4 sm:$0xff]  }
 0x182   : > { %2208 = vmatprep.subr.bf16.mxu1 %v3424_v43  ;;  %2331 = vmatprep.subr.bf16.mxu0 %v3427_v44  ;;  %v839_v43 = vmul.f32 0.01, %v791_v38  ;;  %v3490_v44 = vld [vmem:[#allocation6 + $0x4dc] ss:$20 sps:$4 sm:$0xff]  }
 0x185   : > { %2209 = vmatpush1.bf16.msra.mxu1 %v3422_v48  ;;  %2332 = vmatpush1.bf16.msra.mxu0 %v3425_v49  ;;  %v3491_v48 = vld [vmem:[#allocation6 + $0x4e0] ss:$20 sps:$4 sm:$0xff]   ;;  %v844_v49 = vmax.f32 %v791_v38, %v839_v43  ;;  %v3547_v38 = vld [vmem:[#allocation6 + $0x538] ss:$20 sps:$4 sm:$0xff]   ;;  %v3552_v43 = vld [vmem:[#allocation6 + $0x88] ss:$20 sps:$4 sm:$0xff]  }
 0x186   : > { %2210 = vmatprep.subr.bf16.mxu1 %v3430_v51  ;;  %2333 = vmatprep.subr.bf16.mxu0 %v3433_v52  ;;  %v3494_v51 = vld [vmem:[#allocation6 + $0x500] ss:$20 sps:$4 sm:$0xff]   ;;  %v3497_v52 = vld [vmem:[#allocation6 + $0x508] ss:$20 sps:$4 sm:$0xff]  }
 0x189   : > { %2211 = vmatpush1.bf16.msra.mxu1 %v3428_v54  ;;  %2334 = vmatpush1.bf16.msra.mxu0 %v3431_v55  ;;  %v3981_v54 = vpack.c.bf16 %v844_v49, %v844_v49  ;;  %v3502_v55 = vld [vmem:[#allocation6 + $0x52c] ss:$20 sps:$4 sm:$0xff]  }
 0x18a   : > { %2212 = vmatprep.subr.bf16.mxu1 %v3436_v56  ;;  %2335 = vmatprep.subr.bf16.mxu0 %v3439_v57  ;;  %v3505_v56 = vld [vmem:[#allocation6 + $0x534] ss:$20 sps:$4 sm:$0xff]   ;;  %v3558_v49 = vld [vmem:[#allocation6 + $0xd8] ss:$20 sps:$4 sm:$0xff]  }
 0x18b   : > { %v3500_v57 = vld [vmem:[#allocation6 + $0x528] ss:$20 sps:$4 sm:$0xff]  }
 0x18d   : > { %2213 = vmatpush1.bf16.msra.mxu1 %v3434_v58  ;;  %2336 = vmatpush1.bf16.msra.mxu0 %v3437_v59  ;;  %v3503_v58 = vld [vmem:[#allocation6 + $0x530] ss:$20 sps:$4 sm:$0xff]   ;;  %v3508_v59 = vld [vmem:[#allocation6 + $0x554] ss:$20 sps:$4 sm:$0xff]  }
 0x18e   : > { %2214 = vmatprep.subr.bf16.mxu1 %v3442_v60  ;;  %2337 = vmatprep.subr.bf16.mxu0 %v3445_v61  ;;  %v3511_v60 = vld [vmem:[#allocation6 + $0x55c] ss:$20 sps:$4 sm:$0xff]  }
 0x18f   : > { %v3506_v61 = vld [vmem:[#allocation6 + $0x550] ss:$20 sps:$4 sm:$0xff]  }
 0x191   : > { %2215 = vmatpush1.bf16.msra.mxu1 %v3440_v62  ;;  %2338 = vmatpush1.bf16.msra.mxu0 %v3443_v63  ;;  %v3509_v62 = vld [vmem:[#allocation6 + $0x558] ss:$20 sps:$4 sm:$0xff]   ;;  %v3514_v63 = vld [vmem:[#allocation6 + $0x57c] ss:$20 sps:$4 sm:$0xff]  }
 0x192   : > { %2216 = vmatprep.subr.bf16.mxu1 %v3448_v0  ;;  %2339 = vmatprep.subr.bf16.mxu0 %v3451_v1  ;;  %v3517_v0 = vld [vmem:[#allocation6 + $0x584] ss:$20 sps:$4 sm:$0xff]   ;;  %v3988_v1 = vsub.s32 4, %v3937_v5 }
 0x195   : > { %2217 = vmatpush1.bf16.msra.mxu1 %v3446_v2  ;;  %2340 = vmatpush1.bf16.msra.mxu0 %v3449_v3  ;;  %v3512_v2 = vld [vmem:[#allocation6 + $0x578] ss:$20 sps:$4 sm:$0xff]   ;;  %v3515_v3 = vld [vmem:[#allocation6 + $0x580] ss:$20 sps:$4 sm:$0xff]  }
 0x196   : > { %2218 = vmatprep.subr.bf16.mxu1 %v3454_v4  ;;  %2341 = vmatprep.subr.bf16.mxu0 %v3457_v9  ;;  %v3520_v4 = vld [vmem:[#allocation6 + $0x5a4] ss:$20 sps:$4 sm:$0xff]   ;;  %v3523_v9 = vld [vmem:[#allocation6 + $0x5ac] ss:$20 sps:$4 sm:$0xff]  }
 0x199   : > { %2219 = vmatpush1.bf16.msra.mxu1 %v3452_v10  ;;  %2342 = vmatpush1.bf16.msra.mxu0 %v3455_v11  ;;  %v3973_v16 = vpop.f32.mrb[4].mxu0  ;;  %v3518_v10 = vld [vmem:[#allocation6 + $0x5a0] ss:$20 sps:$4 sm:$0xff]   ;;  %v3521_v11 = vld [vmem:[#allocation6 + $0x5a8] ss:$20 sps:$4 sm:$0xff]  }
 0x19a   : > { %2220 = vmatprep.subr.bf16.mxu1 %v3460_v12  ;;  %2343 = vmatprep.subr.bf16.mxu0 %v3463_v13  ;;  %v833_v19 = vpop.f32.mrb[5].mxu0  ;;  %v3526_v12 = vld [vmem:[#allocation6 + $0x5cc] ss:$20 sps:$4 sm:$0xff]   ;;  %v3529_v13 = vld [vmem:[#allocation6 + $0x5d4] ss:$20 sps:$4 sm:$0xff]  }
 0x19b   : > { %v834_v20 = vpop.f32.mrb[6].mxu0  ;;  %v3535_v19 = vld [vmem:[#allocation6 + $0x5fc] ss:$20 sps:$4 sm:$0xff]  }
 0x19c   : > { %v835_v22 = vpop.f32.mrb[7].mxu0 }
 0x19d   : > { %2221 = vmatpush1.bf16.msra.mxu1 %v3458_v14  ;;  %2344 = vmatpush1.bf16.msra.mxu0 %v3461_v15  ;;  %v3524_v15 = vld [vmem:[#allocation6 + $0x5c8] ss:$20 sps:$4 sm:$0xff]   ;;  %v3533_v22 = vld [vmem:[#allocation6 + $0x5f8] ss:$20 sps:$4 sm:$0xff]  }
 0x19e   : > { %2222 = vmatprep.subr.bf16.mxu1 %v3466_v17  ;;  %2345 = vmatprep.subr.bf16.mxu0 %v3469_v18  ;;  %v3527_v17 = vld [vmem:[#allocation6 + $0x5d0] ss:$20 sps:$4 sm:$0xff]   ;;  %v3532_v18 = vld [vmem:[#allocation6 + $0x5f4] ss:$20 sps:$4 sm:$0xff]  }
 0x1a1   : > { %2223 = vmatpush1.bf16.msra.mxu1 %v3464_v23  ;;  %2346 = vmatpush1.bf16.msra.mxu0 %v3467_v25  ;;  %v3538_v23 = vld [vmem:[#allocation6 + $0x61c] ss:$20 sps:$4 sm:$0xff]   ;;  %v3541_v25 = vld [vmem:[#allocation6 + $0x624] ss:$20 sps:$4 sm:$0xff]  }
 0x1a2   : > { %2224 = vmatprep.subr.bf16.mxu1 %v3472_v26  ;;  %2347 = vmatprep.subr.bf16.mxu0 %v3475_v27  ;;  %v3539_v27 = vld [vmem:[#allocation6 + $0x620] ss:$20 sps:$4 sm:$0xff]  }
 0x1a5   : > { %2225 = vmatpush1.bf16.msra.mxu1 %v3470_v30  ;;  %2348 = vmatpush1.bf16.msra.mxu0 %v3473_v31  ;;  %v3542_v30 = vld [vmem:[#allocation6 + $0x150] ss:$20 sps:$4 sm:$0xff]  }
 0x1a6   : > { %2226 = vmatprep.subr.bf16.mxu1 %v3478_v33  ;;  %2349 = vmatprep.subr.bf16.mxu0 %v3481_v34  ;;  %v3714_v33 = vmov 0.0   ;;  %v3544_v34 = vld [vmem:[#allocation6 + $0x510] ss:$20 sps:$4 sm:$0xff]  }
 0x1a9   : > { %2227 = vmatpush1.bf16.msra.mxu1 %v3476_v35  ;;  %2350 = vmatpush1.bf16.msra.mxu0 %v3479_v36  ;;  %v3545_v35 = vld [vmem:[#allocation6 + $0x178] ss:$20 sps:$4 sm:$0xff]  }
 0x1aa   : > { %2228 = vmatprep.subr.bf16.mxu1 %v3484_v39  ;;  %2351 = vmatprep.subr.bf16.mxu0 %v3487_v40  ;;  %v3546_v36 = vld [vmem:[#allocation6 + $0x38] ss:$20 sps:$4 sm:$0xff]   ;;  %v3548_v39 = vld [vmem:[#allocation6 + $0x1a0] ss:$20 sps:$4 sm:$0xff]  }
 0x1ab   : > { %v3549_v40 = vld [vmem:[#allocation6 + $0x60] ss:$20 sps:$4 sm:$0xff]  }
 0x1ad   : > { %2229 = vmatpush1.bf16.msra.mxu1 %v3482_v41  ;;  %2352 = vmatpush1.bf16.msra.mxu0 %v3485_v42  ;;  %v3550_v41 = vld [vmem:[#allocation6 + $0x560] ss:$20 sps:$4 sm:$0xff]   ;;  %v3551_v42 = vld [vmem:[#allocation6 + $0x1c8] ss:$20 sps:$4 sm:$0xff]  }
 0x1ae   : > { %2230 = vmatprep.subr.bf16.mxu1 %v3490_v44  ;;  %2353 = vmatprep.subr.bf16.mxu0 %v3493_v45  ;;  %v3554_v44 = vld [vmem:[#allocation6 + $0x1f0] ss:$20 sps:$4 sm:$0xff]  }
 0x1af   : > { %v3555_v45 = vld [vmem:[#allocation6 + $0xb0] ss:$20 sps:$4 sm:$0xff]  }
 0x1b1   : > { %2231 = vmatpush1.bf16.msra.mxu1 %v3488_v47  ;;  %2354 = vmatpush1.bf16.msra.mxu0 %v3491_v48  ;;  %v3556_v47 = vld [vmem:[#allocation6 + $0x5b0] ss:$20 sps:$4 sm:$0xff]   ;;  %v3557_v48 = vld [vmem:[#allocation6 + $0x218] ss:$20 sps:$4 sm:$0xff]  }
 0x1b2   : > { %2241 = vmatprep.subr.bf16.mxu1 %v3496_v37  ;;  %2364 = vmatprep.subr.bf16.mxu0 %v3499_v50  ;;  %v3559_v37 = vld [vmem:[#allocation6 + $0x5d8] ss:$20 sps:$4 sm:$0xff]   ;;  %v3560_v50 = vld [vmem:[#allocation6 + $0x240] ss:$20 sps:$4 sm:$0xff]  }
 0x1b4   : > { %2233 = vmatmul.mubr.bf16.vlgmr.msra.gmra.mrb[4].mxu1 %v3981_v54  ;;  %2356 = vmatmul.mubr.bf16.vlgmr.msra.gmra.mrb[8].mxu0 %v3981_v54 }
 0x1b5   : > { %2242 = vmatpush1.bf16.msra.mxu1 %v3494_v51  ;;  %2365 = vmatpush1.bf16.msra.mxu0 %v3497_v52  ;;  %v3561_v51 = vld [vmem:[#allocation6 + $0x100] ss:$20 sps:$4 sm:$0xff]  }
 0x1b6   : > { %2243 = vmatprep.subr.bf16.mxu1 %v3502_v55  ;;  %2366 = vmatprep.subr.bf16.mxu0 %v3505_v56  ;;  %v3562_v52 = vld [vmem:[#allocation6 + $0x600] ss:$20 sps:$4 sm:$0xff]   ;;  %v3563_v55 = vld [vmem:[#allocation6 + $0x268] ss:$20 sps:$4 sm:$0xff]  }
 0x1b7   : > { %2273 = vmatprep.mubr.bf16.mxu1 %v3713_v46  ;;  %2396 = vmatprep.mubr.bf16.mxu0 %v3713_v46  ;;  %v393_v46 = vrot.slane %v3945_v7, %v3988_v1  ;;  %v3530_v7 = vld [vmem:[#allocation6 + $0x5f0] ss:$20 sps:$4 sm:$0xff]   ;;  %v3564_v56 = vld [vmem:[#allocation6 + $0x128] ss:$20 sps:$4 sm:$0xff]  }
 0x1b9   : > { %2244 = vmatpush1.bf16.msra.mxu1 %v3500_v57  ;;  %2367 = vmatpush1.bf16.msra.mxu0 %v3503_v58  ;;  %v832_v14 = vadd.f32 %v3973_v16, %v393_v46  ;;  %v3536_v16 = vld [vmem:[#allocation6 + $0x618] ss:$20 sps:$4 sm:$0xff]   ;;  %v3565_v57 = vld [vmem:[#allocation6 + $0x628] ss:$20 sps:$4 sm:$0xff]   ;;  %v3566_v58 = vld [vmem:[#allocation6 + $0x3d0] ss:$20 sps:$4 sm:$0xff]  }
 0x1ba   : > { %2245 = vmatprep.subr.bf16.mxu1 %v3508_v59  ;;  %2368 = vmatprep.subr.bf16.mxu0 %v3511_v60  ;;  %v3567_v59 = vld [vmem:[#allocation6 + $0x290] ss:$20 sps:$4 sm:$0xff]   ;;  %v3568_v60 = vld [vmem:[#allocation6 + $0x3f8] ss:$20 sps:$4 sm:$0xff]   ;;  %v3578_v46 = vld [vmem:[#allocation6 + $0x4c0] ss:$20 sps:$4 sm:$0xff]  }
 0x1bb   : > { %v841_v20 = vmul.f32 0.01, %v832_v14 }
 0x1bd   : > { %2246 = vmatpush1.bf16.msra.mxu1 %v3506_v61  ;;  %2369 = vmatpush1.bf16.msra.mxu0 %v3509_v62  ;;  %v846_v26 = vmax.f32 %v832_v14, %v841_v20  ;;  %v3569_v61 = vld [vmem:[#allocation6 + $0x2b8] ss:$20 sps:$4 sm:$0xff]   ;;  %v3570_v62 = vld [vmem:[#allocation6 + $0x420] ss:$20 sps:$4 sm:$0xff]  }
 0x1be   : > { %2247 = vmatprep.subr.bf16.mxu1 %v3514_v63  ;;  %2370 = vmatprep.subr.bf16.mxu0 %v3517_v0  ;;  %v3571_v63 = vld [vmem:[#allocation6 + $0x2e0] ss:$20 sps:$4 sm:$0xff]   ;;  %v3572_v0 = vld [vmem:[#allocation6 + $0x448] ss:$20 sps:$4 sm:$0xff]  }
 0x1bf   : > { %v3993_v31 = vpack.c.bf16 %v846_v26, %v846_v26 }
 0x1c1   : > { %2248 = vmatpush1.bf16.msra.mxu1 %v3512_v2  ;;  %2371 = vmatpush1.bf16.msra.mxu0 %v3515_v3  ;;  %v3573_v2 = vld [vmem:[#allocation6 + $0x308] ss:$20 sps:$4 sm:$0xff]   ;;  %v3574_v3 = vld [vmem:[#allocation6 + $0x470] ss:$20 sps:$4 sm:$0xff]  }
 0x1c2   : > { %2249 = vmatprep.subr.bf16.mxu1 %v3520_v4  ;;  %2372 = vmatprep.subr.bf16.mxu0 %v3523_v9  ;;  %v3575_v4 = vld [vmem:[#allocation6 + $0x330] ss:$20 sps:$4 sm:$0xff]   ;;  %v3577_v9 = vld [vmem:[#allocation6 + $0x358] ss:$20 sps:$4 sm:$0xff]  }
 0x1c5   : > { %2250 = vmatpush1.bf16.msra.mxu1 %v3518_v10  ;;  %2373 = vmatpush1.bf16.msra.mxu0 %v3521_v11  ;;  %v3580_v10 = vld [vmem:[#allocation6 + $0x4e8] ss:$20 sps:$4 sm:$0xff]  }
 0x1c6   : > { %2251 = vmatprep.subr.bf16.mxu1 %v3526_v12  ;;  %2374 = vmatprep.subr.bf16.mxu0 %v3529_v13  ;;  %v3581_v11 = vld [vmem:[#allocation6 + $0x3a8] ss:$20 sps:$4 sm:$0xff]   ;;  %v4005_v12 = vld [vmem:[%s4094_s4] sm:$0x1f] }
 0x1c7   : > { %v1097_v13 = vrot.slane %v4005_v12, %v3940_v6  ;;  %v1105_v14 = vrot.slane %v4005_v12, %v3976_v28 }
 0x1c9   : > { %2252 = vmatpush1.bf16.msra.mxu1 %v3524_v15  ;;  %2375 = vmatpush1.bf16.msra.mxu0 %v3527_v17  ;;  %v1101_v15 = vrot.slane %v4005_v12, %v3948_v8  ;;  %v1109_v17 = vrot.slane %v4005_v12, %v3963_v29 }
 0x1ca   : > { %2253 = vmatprep.subr.bf16.mxu1 %v3532_v18  ;;  %2376 = vmatprep.subr.bf16.mxu0 %v3535_v19 }
 0x1cd   : > { %2254 = vmatpush1.bf16.msra.mxu1 %v3530_v7  ;;  %2377 = vmatpush1.bf16.msra.mxu0 %v3533_v22 }
 0x1ce   : > { %2255 = vmatprep.subr.bf16.mxu1 %v3538_v23  ;;  %2378 = vmatprep.subr.bf16.mxu0 %v3541_v25 }
 0x1d1   : > { %2256 = vmatpush1.bf16.msra.mxu1 %v3536_v16  ;;  %2379 = vmatpush1.bf16.msra.mxu0 %v3539_v27 }
 0x1d2   : > { %3060 = vmatprep.subr.bf16.mxu1 %v3542_v30  ;;  %3113 = vmatprep.subr.bf16.mxu0 %v3714_v33 }
 0x1d4   : > { %2274 = vmatmul.mubr.bf16.vlgmr.msra.gmra.mrb[4].mxu1 %v3993_v31  ;;  %2397 = vmatmul.mubr.bf16.vlgmr.msra.gmra.mrb[8].mxu0 %v3993_v31 }
 0x1d5   : > { %3061 = vmatpush3.bf16.msra.mxu1 %v3543_v32  ;;  %2437 = vmatprep.mubr.bf16.mxu1 %v3954_v21  ;;  %v3553_v21 = vld [vmem:[#allocation6 + $0x588] ss:$20 sps:$4 sm:$0xff]  }
 0x1d6   : > { %3114 = vmatpush3.bf16.msra.mxu0 %v3544_v34  ;;  %3062 = vmatprep.subr.bf16.mxu1 %v3545_v35 }
 0x1d7   : > { %3115 = vmatprep.subr.bf16.mxu0 %v3714_v33  ;;  %3129 = vmatprep.mubr.msk.bf16.mxu0 %vm3715_vm1, %v3714_v33 }
 0x1d9   : > { %3063 = vmatpush3.bf16.msra.mxu1 %v3546_v36 }
 0x1da   : > { %3116 = vmatpush3.bf16.msra.mxu0 %v3547_v38  ;;  %3064 = vmatprep.subr.bf16.mxu1 %v3548_v39 }
 0x1db   : > { %3117 = vmatprep.subr.bf16.mxu0 %v3714_v33 }
 0x1dd   : > { %3065 = vmatpush3.bf16.msra.mxu1 %v3549_v40 }
 0x1de   : > { %3118 = vmatpush3.bf16.msra.mxu0 %v3550_v41  ;;  %3066 = vmatprep.subr.bf16.mxu1 %v3551_v42 }
 0x1df   : > { %3119 = vmatprep.subr.bf16.mxu0 %v3714_v33 }
 0x1e1   : > { %3067 = vmatpush3.bf16.msra.mxu1 %v3552_v43 }
 0x1e2   : > { %3120 = vmatpush3.bf16.msra.mxu0 %v3553_v21  ;;  %3068 = vmatprep.subr.bf16.mxu1 %v3554_v44 }
 0x1e3   : > { %3121 = vmatprep.subr.bf16.mxu0 %v3714_v33 }
 0x1e5   : > { %3069 = vmatpush3.bf16.msra.mxu1 %v3555_v45 }
 0x1e6   : > { %3122 = vmatpush3.bf16.msra.mxu0 %v3556_v47  ;;  %3070 = vmatprep.subr.bf16.mxu1 %v3557_v48 }
 0x1e7   : > { %3123 = vmatprep.subr.bf16.mxu0 %v3714_v33 }
 0x1e9   : > { %3071 = vmatpush3.bf16.msra.mxu1 %v3558_v49 }
 0x1ea   : > { %3124 = vmatpush3.bf16.msra.mxu0 %v3559_v37  ;;  %3072 = vmatprep.subr.bf16.mxu1 %v3560_v50 }
 0x1eb   : > { %3125 = vmatprep.subr.bf16.mxu0 %v3714_v33 }
 0x1ed   : > { %3073 = vmatpush3.bf16.msra.mxu1 %v3561_v51  ;;  %v2565_v51 = vld [vmem:[%s4095_s5] sm:$0x1f] }
 0x1ee   : > { %3126 = vmatpush3.bf16.msra.mxu0 %v3562_v52  ;;  %3074 = vmatprep.subr.bf16.mxu1 %v3563_v55 }
 0x1ef   : > { %3127 = vmatprep.subr.bf16.mxu0 %v3714_v33 }
 0x1f1   : > { %3075 = vmatpush3.bf16.msra.mxu1 %v3564_v56 }
 0x1f2   : > { %3128 = vmatpush3.bf16.msra.mxu0 %v3565_v57  ;;  %3082 = vmatprep.subr.bf16.mxu1 %v3566_v58 }
 0x1f4   : > { %2438 = vmatmul.mubr.bf16.vlgmr.msra.gmra.mrb[8].mxu1 %v3956_v24  ;;  %v3576_v24 = vld [vmem:[#allocation6 + $0x498] ss:$20 sps:$4 sm:$0xff]  }
 0x1f5   : > { %3130 = vmatmul.mubr.bf16.vlgmr.msra.gmra.mrb[12].mxu0 %v3993_v31  ;;  %3083 = vmatpush3.bf16.msra.mxu1 %v3567_v59 }
 0x1f6   : > { %2477 = vmatprep.mubr.bf16.mxu1 %v3969_v53  ;;  %3084 = vmatprep.subr.bf16.mxu1 %v3568_v60  ;;  %v3579_v53 = vld [vmem:[#allocation6 + $0x380] ss:$20 sps:$4 sm:$0xff]   ;;  %v2570_v60 = vrot.slane %v2565_v51, %v3940_v6 }
 0x1f9   : > { %3085 = vmatpush3.bf16.msra.mxu1 %v3569_v61 }
 0x1fa   : > { %3086 = vmatprep.subr.bf16.mxu1 %v3570_v62 }
 0x1fd   : > { %3087 = vmatpush3.bf16.msra.mxu1 %v3571_v63  ;;  %v2574_v63 = vrot.slane %v2565_v51, %v3948_v8 }
 0x1fe   : > { %3088 = vmatprep.subr.bf16.mxu1 %v3572_v0  ;;  %v2578_v0 = vrot.slane %v2565_v51, %v3976_v28 }
 0x201   : > { %3089 = vmatpush3.bf16.msra.mxu1 %v3573_v2 }
 0x202   : > { %3090 = vmatprep.subr.bf16.mxu1 %v3574_v3 }
 0x205   : > { %3091 = vmatpush3.bf16.msra.mxu1 %v3575_v4 }
 0x206   : > { %3092 = vmatprep.subr.bf16.mxu1 %v3576_v24 }
 0x209   : > { %3093 = vmatpush3.bf16.msra.mxu1 %v3577_v9  ;;  %v2582_v9 = vrot.slane %v2565_v51, %v3963_v29 }
 0x20a   : > { %3094 = vmatprep.subr.bf16.mxu1 %v3578_v46 }
 0x20d   : > { %3095 = vmatpush3.bf16.msra.mxu1 %v3579_v53 }
 0x20e   : > { %3096 = vmatprep.subr.bf16.mxu1 %v3580_v10 }
 0x211   : > { %3097 = vmatpush3.bf16.msra.mxu1 %v3581_v11 }
 0x214   : > { %2478 = vmatmul.mubr.bf16.vlgmr.msra.gmra.mrb[12].mxu1 %v3981_v54 }
 0x2a7   : > { %v2275_v18 = vpop.f32.mrb[4].mxu1  ;;  %v2398_v19 = vpop.f32.mrb[8].mxu0 }
 0x2a8   : > { %v3133_v54 = vadd.f32 %v2275_v18, %v1097_v13  ;;  %v3135_v20 = vadd.f32 %v2398_v19, %v1105_v14  ;;  %v2277_v7 = vpop.f32.mrb[5].mxu1  ;;  %v2400_v22 = vpop.f32.mrb[9].mxu0 }
 0x2a9   : > { %v3134_v23 = vadd.f32 %v2277_v7, %v1101_v15  ;;  %v3136_v25 = vadd.f32 %v2400_v22, %v1109_v17  ;;  %v2279_v26 = vpop.f32.mrb[6].mxu1  ;;  %v2402_v16 = vpop.f32.mrb[10].mxu0 }
 0x2aa   : > { %v2525_v27 = vmul.f32 0.01, %v3133_v54  ;;  %v2527_v30 = vmul.f32 0.01, %v3135_v20  ;;  %v2280_v31 = vpop.f32.mrb[7].mxu1  ;;  %v2403_v32 = vpop.f32.mrb[11].mxu0 }
 0x2ab   : > { %v2526_v33 = vmul.f32 0.01, %v3134_v23  ;;  %v2528_v34 = vmul.f32 0.01, %v3136_v25  ;;  %v1113_v31 = vrot.slane %v4005_v12, %v3988_v1 }
 0x2ac   : > { %v4015_v35 = vmax.f32 %v3133_v54, %v2525_v27  ;;  %v4017_v36 = vmax.f32 %v3135_v20, %v2527_v30 }
 0x2ad   : > { %v4019_v38 = vmax.f32 %v3134_v23, %v2526_v33  ;;  %v4021_v39 = vmax.f32 %v3136_v25, %v2528_v34 }
 0x2ae   : > { %v2535_v40 = vrot.slane %v4015_v35, 4  ;;  %v2547_v41 = vrot.slane %v4017_v36, 4 }
 0x2af   : > { %v2541_v42 = vrot.slane %v4019_v38, 4  ;;  %v2553_v43 = vrot.slane %v4021_v39, 4 }
 0x2b0   : > { %v2536_v21 = vadd.f32 %v2535_v40, %v4015_v35  ;;  %v2548_v44 = vadd.f32 %v2547_v41, %v4017_v36 }
 0x2b1   : > { %v2542_v45 = vadd.f32 %v2541_v42, %v4019_v38  ;;  %v2554_v47 = vadd.f32 %v2553_v43, %v4021_v39 }
 0x2b2   : > { %v2537_v48 = vrot.slane %v2536_v21, 2  ;;  %v2549_v49 = vrot.slane %v2548_v44, 2 }
 0x2b3   : > { %v2543_v37 = vrot.slane %v2542_v45, 2  ;;  %v2555_v50 = vrot.slane %v2554_v47, 2 }
 0x2b4   : > { %v2538_v52 = vadd.f32 %v2537_v48, %v2536_v21  ;;  %v2550_v55 = vadd.f32 %v2549_v49, %v2548_v44 }
 0x2b5   : > { %v2544_v56 = vadd.f32 %v2543_v37, %v2542_v45  ;;  %v2556_v57 = vadd.f32 %v2555_v50, %v2554_v47 }
 0x2b6   : > { %v2539_v58 = vrot.slane %v2538_v52, 1  ;;  %v2551_v59 = vrot.slane %v2550_v55, 1 }
 0x2b7   : > { %v2545_v61 = vrot.slane %v2544_v56, 1  ;;  %v2557_v62 = vrot.slane %v2556_v57, 1 }
 0x2b8   : > { %v2540_v2 = vadd.f32 %v2539_v58, %v2538_v52  ;;  %v2552_v3 = vadd.f32 %v2551_v59, %v2550_v55  ;;  %v2586_v52 = vrot.slane %v2565_v51, %v3988_v1  ;;  %v2618_v51 = vstv (!%p3055_p9), %s3056_s16 }
 0x2b9   : > { %v2546_v4 = vadd.f32 %v2545_v61, %v2544_v56  ;;  %v2558_v24 = vadd.f32 %v2557_v62, %v2556_v57  ;;  %v2619_v59 = vadd.s32 (!%p3055_p9), %v2618_v51, %v3937_v5 }
 0x2ba   : > { %v2592_v46 = vmul.f32 %v2570_v60, %v2540_v2  ;;  %v2594_v10 = vmul.f32 %v2578_v0, %v2552_v3 }
 0x2bb   : > { %v2593_v53 = vmul.f32 %v2574_v63, %v2546_v4  ;;  %v2595_v13 = vmul.f32 %v2582_v9, %v2558_v24  ;;  %vm2620_vm4 = vcmp.lt.s32.totalorder (!%p3055_p9), %v2619_v59, 20 }
 0x2bc   : > { %v2598_v11 = vsel %vm2597_vm2, %v2592_v46, 0.0  ;;  %v2601_v17 = vsel %vm2597_vm2, %v2594_v10, 0.0  ;;  %v2623_v60 = vsel (!%p3055_p9), %vm2620_vm4, %v4015_v35, 0.0  ;;  %v2624_v61 = vsel (!%p3055_p9), %vm2620_vm4, %v4019_v38, 0.0 }
 0x2bd   : > { %v2599_v14 = vsel %vm2597_vm2, %v2593_v53, 0.0  ;;  %v2603_v19 = vsel %vm2597_vm2, %v2595_v13, 0.0  ;;  %v2625_v62 = vsel (!%p3055_p9), %vm2620_vm4, %v4017_v36, 0.0  ;;  %v2626_v63 = vsel (!%p3055_p9), %vm2620_vm4, %v4021_v39, 0.0  ;;  %v2658_v36 = vld [vmem:[%s4095_s5] sm:$0x1f] (!%p3055_p9) }
 0x2be   : > { %v2600_v15 = vadd.f32 %v2599_v14, %v2598_v11  ;;  %v2628_v2 = vrot.slane (!%p3055_p9), %v2623_v60, 4  ;;  %v2634_v3 = vrot.slane (!%p3055_p9), %v2624_v61, 4  ;;  %v2640_v4 = vrot.slane (!%p3055_p9), %v2625_v62, 4 }
 0x2bf   : > { %v2646_v24 = vrot.slane (!%p3055_p9), %v2626_v63, 4 }
 0x2c0   : > { %v2602_v18 = vadd.f32 %v2601_v17, %v2600_v15  ;;  %v2629_v46 = vadd.f32 (!%p3055_p9), %v2628_v2, %v2623_v60  ;;  %v2635_v53 = vadd.f32 (!%p3055_p9), %v2634_v3, %v2624_v61  ;;  %v2641_v10 = vadd.f32 (!%p3055_p9), %v2640_v4, %v2625_v62 }
 0x2c1   : > { %v2647_v11 = vadd.f32 (!%p3055_p9), %v2646_v24, %v2626_v63 }
 0x2c2   : > { %v2604_v54 = vadd.f32 %v2603_v19, %v2602_v18  ;;  %v2630_v13 = vrot.slane (!%p3055_p9), %v2629_v46, 2  ;;  %v2636_v14 = vrot.slane (!%p3055_p9), %v2635_v53, 2  ;;  %v2642_v35 = vrot.slane (!%p3055_p9), %v2641_v10, 2 }
 0x2c3   : > { %v2648_v38 = vrot.slane (!%p3055_p9), %v2647_v11, 2 }
 0x2c4   : > { %v2631_v15 = vadd.f32 (!%p3055_p9), %v2630_v13, %v2629_v46  ;;  %v2637_v17 = vadd.f32 (!%p3055_p9), %v2636_v14, %v2635_v53  ;;  %v2643_v18 = vadd.f32 (!%p3055_p9), %v2642_v35, %v2641_v10 }
 0x2c5   : > { %v2649_v19 = vadd.f32 (!%p3055_p9), %v2648_v38, %v2647_v11 }
 0x2c7   : > { %v3076_v20 = vpop.f32.mrb[8].mxu1 }
 0x2c8   : > { %v2519_v7 = vpop.f32.mrb[12].mxu0  ;;  %v3077_v22 = vpop.f32.mrb[9].mxu1 }
 0x2c9   : > { %v3078_v23 = vadd.f32 %v3077_v22, %v3076_v20  ;;  %v3131_v25 = vpop.f32.mrb[13].mxu0  ;;  %v3079_v26 = vpop.f32.mrb[10].mxu1  ;;  %v2663_v20 = vrot.slane (!%p3055_p9), %v2658_v36, %v3940_v6  ;;  %v2632_v22 = vrot.slane (!%p3055_p9), %v2631_v15, 1 }
 0x2ca   : > { %v2522_v16 = vpop.f32.mrb[14].mxu0  ;;  %v3080_v27 = vpop.f32.mrb[11].mxu1  ;;  %v2644_v25 = vrot.slane (!%p3055_p9), %v2643_v18, 1  ;;  %v2671_v26 = vrot.slane (!%p3055_p9), %v2658_v36, %v3976_v28 }
 0x2cb   : > { %v3132_v30 = vpop.f32.mrb[15].mxu0  ;;  %v2440_v34 = vadd.f32 %v3078_v23, %v1113_v31  ;;  %v2638_v23 = vrot.slane (!%p3055_p9), %v2637_v17, 1  ;;  %v2650_v16 = vrot.slane (!%p3055_p9), %v2649_v19, 1  ;;  %v2633_v31 = vadd.f32 (!%p3055_p9), %v2632_v22, %v2631_v15 }
 0x2cc   : > { %v2675_v30 = vrot.slane (!%p3055_p9), %v2658_v36, %v3963_v29 }
 0x2e7   : > { %v3098_v32 = vpop.f32.mrb[12].mxu1 }
 0x2e8   : > { %v3099_v33 = vpop.f32.mrb[13].mxu1 }
 0x2e9   : > { %v3100_v40 = vadd.f32 %v3099_v33, %v3098_v32  ;;  %v3101_v41 = vpop.f32.mrb[14].mxu1  ;;  %v2639_v32 = vadd.f32 (!%p3055_p9), %v2638_v23, %v2637_v17  ;;  %v2645_v33 = vadd.f32 (!%p3055_p9), %v2644_v25, %v2643_v18 }
 0x2ea   : > { %v3102_v42 = vpop.f32.mrb[15].mxu1 }
 0x2eb   : > { %v2480_v43 = vadd.f32 %v3100_v40, %v2440_v34  ;;  %v2679_v34 = vrot.slane (!%p3055_p9), %v2658_v36, %v3988_v1  ;;  %v2651_v40 = vadd.f32 (!%p3055_p9), %v2650_v16, %v2649_v19  ;;  %v2685_v42 = vmul.f32 (!%p3055_p9), %v2663_v20, %v2633_v31 }
 0x2ed   : > { %v2520_v21 = vadd.f32 %v2519_v7, %v2480_v43  ;;  %v2667_v7 = vrot.slane (!%p3055_p9), %v2658_v36, %v3948_v8  ;;  %v2687_v8 = vmul.f32 (!%p3055_p9), %v2671_v26, %v2645_v33  ;;  %v2688_v43 = vmul.f32 (!%p3055_p9), %v2675_v30, %v2651_v40 }
 0x2ef   : > { %v2529_v44 = vmul.f32 0.01, %v2520_v21  ;;  %v2686_v6 = vmul.f32 (!%p3055_p9), %v2667_v7, %v2639_v32 }
 0x2f1   : > { %v2534_v45 = vmax.f32 %v2520_v21, %v2529_v44  ;;  %v2690_v44 = vsel (!%p3055_p9), %vm2597_vm2, %v2685_v42, 0.0  ;;  %v2691_v28 = vsel (!%p3055_p9), %vm2597_vm2, %v2686_v6, 0.0 }
 0x2f2   : > { %v2692_v29 = vadd.f32 (!%p3055_p9), %v2691_v28, %v2690_v44 }
 0x2f3   : > { %v2559_v47 = vrot.slane %v2534_v45, 4  ;;  %v2627_v0 = vsel (!%p3055_p9), %vm2620_vm4, %v2534_v45, 0.0 }
 0x2f4   : > { %v2652_v9 = vrot.slane (!%p3055_p9), %v2627_v0, 4 }
 0x2f5   : > { %v2560_v48 = vadd.f32 %v2559_v47, %v2534_v45  ;;  %v2693_v45 = vsel (!%p3055_p9), %vm2597_vm2, %v2687_v8, 0.0  ;;  %v2695_v47 = vsel (!%p3055_p9), %vm2597_vm2, %v2688_v43, 0.0 }
 0x2f6   : > { %v2653_v5 = vadd.f32 (!%p3055_p9), %v2652_v9, %v2627_v0 }
 0x2f7   : > { %v2561_v49 = vrot.slane %v2560_v48, 2 }
 0x2f8   : > { %v2654_v39 = vrot.slane (!%p3055_p9), %v2653_v5, 2 }
 0x2f9   : > { %v2562_v37 = vadd.f32 %v2561_v49, %v2560_v48  ;;  %v2694_v48 = vadd.f32 (!%p3055_p9), %v2693_v45, %v2692_v29 }
 0x2fb   : > { %v2563_v50 = vrot.slane %v2562_v37, 1  ;;  %v2696_v49 = vadd.f32 (!%p3055_p9), %v2695_v47, %v2694_v48 }
 0x2fd   : > { %v2564_v12 = vadd.f32 %v2563_v50, %v2562_v37 }
 0x2ff   : > { %v2596_v55 = vmul.f32 %v2586_v52, %v2564_v12 }
 0x301   : > { %v2605_v56 = vsel %vm2597_vm2, %v2596_v55, 0.0 }
 0x302   : > { %v2606_v57 = vadd.f32 %v2605_v56, %v2604_v54  ;;  %v2655_v54 = vadd.f32 (!%p3055_p9), %v2654_v39, %v2653_v5 }
 0x304   : > { %2607 = vadd.xlane.f32.xlu0 %v2606_v57  ;;  %v2656_v27 = vrot.slane (!%p3055_p9), %v2655_v54, 1 }
 0x306   : > { %v2657_v41 = vadd.f32 (!%p3055_p9), %v2656_v27, %v2655_v54 }
 0x308   : > { %v2689_v21 = vmul.f32 (!%p3055_p9), %v2679_v34, %v2657_v41 }
 0x30a   : > { %v2697_v1 = vsel (!%p3055_p9), %vm2597_vm2, %v2689_v21, 0.0 }
 0x30b   : > { %v2698_v37 = vadd.f32 (!%p3055_p9), %v2697_v1, %v2696_v49 }
 0x30d   : > { %2699 = vadd.xlane.f32.xlu0 (!%p3055_p9), %v2698_v37 }
 0x38c   : > { %2614 = sbr.rel (%p3055_p9) target bundleno = 924 (0x39c), region = 60 }
 0x391   : > { %v2608_v58 = vpop.xlane.xlu0 %2607 }
 0x392   : > { %2610 = vst.msk [vmem:[%s4051_s14] sm:$0x1] %vm2609_vm3, %v2608_v58 }
 0x39a   : > { %v2700_v50 = vpop.xlane.xlu0 %2699 }
 0x39b   : > { %2701 = vst.msk [vmem:[%s4051_s14] sm:$0x1] %vm2609_vm3, %v2700_v50 }
 0x39c PF: > { %p17_p8 = scmp.ge.s32.totalorder %s3844_s15, 5   ;;  %s4108_s21 = smov %s3698_s22 }
 0x39d   : > { %s4109_s22 = smov %s3702_s23  ;;  %s4110_s23 = smov %s3855_s20 }
 0x39e   : > { %s4111_s24 = smov %s3844_s15  ;;  %19 = sbr.rel (!%p17_p8) target bundleno = 4 (0x4), region = 96 }
 0x3a5   :  { %2719 = vsyncpa [#allocation3], 1 }
 0x3a6   :  { %2721 = vsyncpa [#allocation3 + $0x1], 1 }
 0x3a7   :  { %2722 = vsyncpa [#allocation5], 1 }

</bundles_post_ra>
